<compile_context>
chip_gen: v7x
topology: tpu7x:2x2x1
jax: 0.10.0
libtpu: 0.0.40
codegen_flags: <defaults>
</compile_context>

<pallas_src>
import math

import numpy as np
import jax
import jax.numpy as jnp
from jax.experimental import pallas as pl
from jax.experimental.pallas import tpu as pltpu


def degree_to_dim(degree: int) -> int:
    return 2 * degree + 1


def _round_up(x: int, m: int) -> int:
    return ((x + m - 1) // m) * m


def _vmem_capacity_bytes() -> int:
    try:
        cap = getattr(pltpu.get_tpu_info(), "vmem_capacity_bytes", None)
        if cap:
            return int(cap)
    except Exception:
        pass
    return 64 * 1024 * 1024  # conservative fallback: v7x per-TensorCore VMEM


# ----------------------------------------------------------------------------
# Pallas kernel: one (node-block, edge-tile) grid step.
# ----------------------------------------------------------------------------
def _attention_se3_kernel(tile_base_ref, tile_count_ref,            # prefetch
                          key_ref, value_ref, onehot_ref, query_ref,
                          head_sel_ref, expand_ref, den_expand_ref,
                          out_ref, m_sc):
    # tile_base_ref  : [n_nb] i32 SMEM  first edge-tile index of each node block
    # tile_count_ref : [n_nb] i32 SMEM  number of edge tiles of each node block
    # key_ref        : [TE, HDp]   bf16  edge keys for this edge tile
    # value_ref      : [TE, HCMp]  bf16  edge values (+ H "ones" denom columns)
    # onehot_ref     : [TE, NB]    bf16  one-hot(local dst) for this node block
    # query_ref      : [NB, HDp]   bf16  node queries (resident per node block)
    # head_sel_ref   : [HDp, H]    bf16  key-feature -> head selector * scale
    # expand_ref     : [H, HCMp]   bf16  head -> (value cols + denom col) bcast
    # den_expand_ref : [HCMp,HCMp] bf16  denom col -> that head's value cols
    # out_ref        : [NB, HCMp]  f32   resident accumulator / final output
    # m_sc           : [1, H]      f32   running per-head max (global shift)
    nb = pl.program_id(0)
    t = pl.program_id(1)

    @pl.when(t == 0)
    def _init():
        m_sc[...] = jnp.full(m_sc.shape, -1e30, m_sc.dtype)
        out_ref[...] = jnp.zeros_like(out_ref)

    @pl.when(t < tile_count_ref[nb])
    def _accumulate():
        onehot = onehot_ref[...]                          # [TE, NB]   bf16
        k = key_ref[...]                                  # [TE, HDp]  bf16
        v = value_ref[...]                                # [TE, HCMp] bf16
        q = query_ref[...]                                # [NB, HDp]  bf16
        head_sel = head_sel_ref[...]                      # [HDp, H]   bf16
        expand = expand_ref[...]                          # [H, HCMp]  bf16

        # gather destination-node queries onto edges (bf16 MXU, exact select)
        q_edge = jnp.dot(onehot, q, preferred_element_type=jnp.float32)
        prod = (k.astype(jnp.float32) * q_edge).astype(jnp.bfloat16)
        # per-head logits; 1/sqrt(num_features) is pre-folded into head_sel
        logits = jnp.dot(prod, head_sel,
                         preferred_element_type=jnp.float32)          # [TE, H]

        # mask padded (dummy) edges: their one-hot row is all zero
        valid = jnp.sum(onehot.astype(jnp.float32), axis=-1, keepdims=True)
        logits = jnp.where(valid > 0.5, logits, -1e30)

        # online softmax with a global per-head running max (shift cancels
        # per destination node in the final normalize)
        m_prev = m_sc[...]                                             # [1, H]
        m_new = jnp.maximum(m_prev, jnp.max(logits, axis=0, keepdims=True))
        m_sc[...] = m_new

        p = jnp.exp(logits - m_new).astype(jnp.bfloat16)               # [TE, H]
        # broadcast per-head weights over value columns AND the denominator
        # columns via the bf16 expand matrix (no [TE,H,CM] reshape)
        p_full = jnp.dot(p, expand, preferred_element_type=jnp.float32)
        wv = (p_full * v.astype(jnp.float32)).astype(jnp.bfloat16)     # [TE, HCMp]

        # scatter-add onto destination nodes: contract the edge axis directly
        # (no onehot.T materialization); numerator and denominator in one pass
        dnums = (((0,), (0,)), ((), ()))
        acc_tile = jax.lax.dot_general(onehot, wv, dimension_numbers=dnums,
                                       preferred_element_type=jnp.float32)

        c = jnp.exp(m_prev - m_new).astype(jnp.bfloat16)               # [1, H]
        c_full = jnp.dot(c, expand, preferred_element_type=jnp.float32)
        out_ref[...] = out_ref[...] * c_full + acc_tile

    @pl.when(t == pl.num_programs(1) - 1)
    def _finalize():
        acc = out_ref[...]                                             # [NB, HCMp]
        # per-node denominator broadcast to every column of its head
        den = jnp.dot(acc.astype(jnp.bfloat16), den_expand_ref[...],
                      preferred_element_type=jnp.float32)              # [NB, HCMp]
        den_safe = jnp.where(den > 0.0, den, 1.0)
        inv = pl.reciprocal(den_safe, approx=True)
        inv = inv * (2.0 - den_safe * inv)          # one Newton-Raphson step
        inv = jnp.where(den > 0.0, inv, 0.0)        # isolated nodes / padding -> 0
        out_ref[...] = acc * inv


def attention_se3_pallas(tile_base, tile_count, key_p, value_p, onehot_p,
                         query_p, head_sel, expand, den_expand,
                         *, edge_tile, node_block, n_tiles_max):
    Ep, HDp = key_p.shape
    HCMp = value_p.shape[1]
    Np = query_p.shape[0]
    H = head_sel.shape[1]
    NB = node_block
    TE = edge_tile
    n_nb = Np // NB

    # Advisory cost estimate for the XLA scheduler around the custom call.
    flops = int(2 * Ep * NB * HDp            # onehot @ q gather
                + 2 * Ep * HDp * H           # per-head logit reduction
                + 2 * Ep * H * HCMp          # head -> value/denom broadcast
                + 2 * Ep * NB * HCMp         # fused numerator+denominator scatter
                + 2 * Np * HCMp * HCMp)      # finalize denominator broadcast
    bytes_accessed = int(2 * (key_p.size + value_p.size + onehot_p.size
                              + query_p.size + head_sel.size + expand.size
                              + den_expand.size)
                         + 4 * Np * HCMp)
    cost = pl.CostEstimate(flops=flops, transcendentals=int(Ep * H),
                           bytes_accessed=bytes_accessed)

    # VMEM bound: double-buffered edge streams + resident query / accumulator
    # + selectors; capped at 3/4 of physical VMEM (48 MiB v7x, 96 MiB v5e/v6e).
    bf16, f32 = 2, 4
    vmem_needed = (2 * TE * (HDp + HCMp + NB) * bf16
                   + 2 * NB * HDp * bf16
                   + 2 * NB * HCMp * f32
                   + 2 * (HDp * H + H * HCMp + HCMp * HCMp) * bf16
                   + 8 * 128 * f32)
    vmem_cap = _vmem_capacity_bytes()
    vmem_limit = int(min(3 * vmem_cap // 4,
                         max(2 * vmem_needed, 32 * 1024 * 1024)))

    def edge_map(nb, t, tb, tc):
        # Clamp skipped steps (t >= tile_count[nb]) to the block's last valid
        # tile: the block index repeats, so Pallas elides the DMA, and the
        # index can never run past the padded edge array.
        last = jnp.maximum(tc[nb] - 1, 0)
        return (tb[nb] + jnp.minimum(t, last), 0)

    grid_spec = pltpu.PrefetchScalarGridSpec(
        num_scalar_prefetch=2,
        grid=(n_nb, n_tiles_max),
        in_specs=[
            pl.BlockSpec((TE, HDp), edge_map),                            # key
            pl.BlockSpec((TE, HCMp), edge_map),                           # value + ones
            pl.BlockSpec((TE, NB), edge_map),                             # local onehot
            pl.BlockSpec((NB, HDp), lambda nb, t, tb, tc: (nb, 0)),       # query
            pl.BlockSpec((HDp, H), lambda nb, t, tb, tc: (0, 0)),         # head_sel
            pl.BlockSpec((H, HCMp), lambda nb, t, tb, tc: (0, 0)),        # expand
            pl.BlockSpec((HCMp, HCMp), lambda nb, t, tb, tc: (0, 0)),     # den_expand
        ],
        out_specs=pl.BlockSpec((NB, HCMp), lambda nb, t, tb, tc: (nb, 0)),
        scratch_shapes=[pltpu.VMEM((1, H), jnp.float32)],   # running max
    )
    return pl.pallas_call(
        _attention_se3_kernel,
        out_shape=jax.ShapeDtypeStruct((Np, HCMp), jnp.float32),
        grid_spec=grid_spec,
        compiler_params=pltpu.CompilerParams(
            dimension_semantics=("parallel", "arbitrary"),
            vmem_limit_bytes=vmem_limit),
        cost_estimate=cost,
    )(tile_base, tile_count, key_p, value_p, onehot_p, query_p,
      head_sel, expand, den_expand)


# ----------------------------------------------------------------------------
# Module-level wrapper (fiber bookkeeping / edge binning / padding).
# ----------------------------------------------------------------------------
def attention_se3_forward(value, key, query, dst, *, num_nodes, num_heads,
                          key_degrees, key_num_features, value_degrees,
                          edge_tile=None, node_block=128):
    """
    value : fused edge values  [E, C, sum(2d+1 for d in value_degrees)]
    key   : fused edge keys    [E, Ck, sum(2d+1 for d in key_degrees)]
    query : dict {str(d): [N, ch_d, 2d+1]}
    dst   : int32 [E] destination node of each edge (concrete array)
    """
    E = key.shape[0]
    H = num_heads
    key_flat = key.reshape(E, -1)
    q_cat = jnp.concatenate([query[str(d)] for d in key_degrees], axis=-1)
    N = q_cat.shape[0]
    query_flat = q_cat.reshape(N, -1)
    value_flat = value.reshape(E, -1)

    HD = key_flat.shape[1]
    HCM = value_flat.shape[1]
    Dk = HD // H
    CM = HCM // H

    # ---- static geometry ---------------------------------------------------
    NB = max(128, _round_up(node_block, 128))        # lane width of local onehot
    Np = _round_up(max(num_nodes, 1), NB)
    n_nb = Np // NB                                   # >= 2 for >128 nodes (v7x)
    HDp = _round_up(HD, 128)
    HCMp = _round_up(HCM + H, 128)                    # value cols + H denom cols

    # Large edge tiles amortize the ~0.35us grid-step overhead; multiple of 16
    # for bf16 sublane packing; capped at the average per-block edge count so
    # per-block padding waste stays bounded.
    if edge_tile is None:
        edge_tile = 2048 if _vmem_capacity_bytes() >= 96 * 1024 * 1024 else 1024
    avg_per_block = max((E + n_nb - 1) // n_nb, 1)
    TE = max(16, min(_round_up(edge_tile, 16), _round_up(avg_per_block, 16)))

    # ---- host-side edge binning: group edges by destination node block ------
    # TODO(synk): host/numpy preprocessing (not jit-able); a traced variant
    # would use jnp sorting with a static per-block capacity bound.
    dst_np = np.asarray(dst).astype(np.int64)
    blk = dst_np // NB
    order = np.argsort(blk, kind="stable")
    counts = np.bincount(blk, minlength=n_nb).astype(np.int64)
    padded_counts = ((counts + TE - 1) // TE) * TE
    offsets = np.concatenate([[0], np.cumsum(padded_counts)])[:-1]
    Ep = int(max(int(padded_counts.sum()), TE))
    total_tiles = Ep // TE
    n_tiles_max = int(max(int(padded_counts.max() // TE) if E > 0 else 0, 1))
    tile_base = np.minimum(offsets // TE, total_tiles - 1).astype(np.int32)
    tile_count = (padded_counts // TE).astype(np.int32)

    starts = np.concatenate([[0], np.cumsum(counts)])[:-1]
    sorted_blk = blk[order]
    local_idx = np.arange(E, dtype=np.int64) - starts[sorted_blk]
    pos = jnp.asarray((offsets[sorted_blk] + local_idx).astype(np.int32))
    perm = jnp.asarray(order.astype(np.int32))

    bf = jnp.bfloat16
    key_p = jnp.zeros((Ep, HDp), bf).at[pos, :HD].set(key_flat[perm].astype(bf))
    val_ext = jnp.concatenate([value_flat[perm].astype(bf),
                               jnp.ones((E, H), bf)], axis=-1)   # ones = denom cols
    value_p = jnp.zeros((Ep, HCMp), bf).at[pos, :HCM + H].set(val_ext)
    query_p = jnp.zeros((Np, HDp), bf).at[:N, :HD].set(query_flat.astype(bf))

    dst_local = jnp.asarray((dst_np - blk * NB)[order].astype(np.int32))
    onehot_rows = jax.nn.one_hot(dst_local, NB, dtype=bf)        # exact in bf16
    onehot_p = jnp.zeros((Ep, NB), bf).at[pos].set(onehot_rows)

    # ---- static selector matrices (host, exact 0/1; scale folded) -----------
    scale = 1.0 / math.sqrt(key_num_features)
    j = np.arange(HDp)
    head_sel = (((j[:, None] // Dk) == np.arange(H)[None, :])
                & (j[:, None] < HD)).astype(np.float32) * scale
    head_sel = jnp.asarray(head_sel, dtype=bf)                   # [HDp, H]

    ci = np.arange(HCMp)
    expand = np.zeros((H, HCMp), np.float32)
    expand[:, :HCM] = (ci[None, :HCM] // CM) == np.arange(H)[:, None]
    expand[np.arange(H), HCM + np.arange(H)] = 1.0               # denominator cols
    expand = jnp.asarray(expand, dtype=bf)                       # [H, HCMp]

    den_expand = np.zeros((HCMp, HCMp), np.float32)
    for h in range(H):
        den_expand[HCM + h, :HCM] = (np.arange(HCM) // CM) == h
    den_expand = jnp.asarray(den_expand, dtype=bf)               # [HCMp, HCMp]

    out_p = attention_se3_pallas(
        jnp.asarray(tile_base), jnp.asarray(tile_count),
        key_p, value_p, onehot_p, query_p, head_sel, expand, den_expand,
        edge_tile=TE, node_block=NB, n_tiles_max=n_tiles_max)

    C, M = value.shape[1], value.shape[2]
    feat_out = out_p[:num_nodes, :HCM].reshape(num_nodes, C, M)
    dims = [degree_to_dim(d) for d in value_degrees]
    splits = list(np.cumsum(dims)[:-1])
    parts = jnp.split(feat_out, splits, axis=-1)                 # unfuse_features
    return {str(d): p for d, p in zip(value_degrees, parts)}


# ----------------------------------------------------------------------------
# Pure-JAX reference (segment ops) for correctness check.
# Inputs are cast to bf16 (like the kernel) but all math is f32.
# ----------------------------------------------------------------------------
def _reference(key_flat, query_flat, value_flat, dst, *, num_heads,
               key_num_features, num_nodes):
    E = key_flat.shape[0]
    H = num_heads
    k = key_flat.astype(jnp.bfloat16).astype(jnp.float32).reshape(E, H, -1)
    q = query_flat.astype(jnp.bfloat16).astype(jnp.float32).reshape(num_nodes, H, -1)
    v = value_flat.astype(jnp.bfloat16).astype(jnp.float32).reshape(E, H, -1)
    logits = jnp.einsum('ehd,ehd->eh', k, q[dst]) / math.sqrt(key_num_features)
    m = jax.ops.segment_max(logits, dst, num_segments=num_nodes)
    p = jnp.exp(logits - m[dst])
    denom = jax.ops.segment_sum(p, dst, num_segments=num_nodes)
    alpha = p / denom[dst]
    out = jax.ops.segment_sum(alpha[:, :, None] * v, dst, num_segments=num_nodes)
    return out.reshape(num_nodes, -1)


if __name__ == "__main__":
    # Fiber config: key fiber = value fiber = {degree 0: 8 ch, degree 1: 8 ch}
    NUM_HEADS = 2
    KEY_DEGREES = (0, 1)
    VALUE_DEGREES = (0, 1)
    KEY_CHANNELS = 8
    VALUE_CHANNELS = 8
    KEY_NUM_FEATURES = sum(KEY_CHANNELS * degree_to_dim(d) for d in KEY_DEGREES)  # 32
    MK_SUM = sum(degree_to_dim(d) for d in KEY_DEGREES)                           # 4
    M_SUM = sum(degree_to_dim(d) for d in VALUE_DEGREES)                          # 4

    N_NODES = 8
    N_EDGES = 20   # deliberately NOT a multiple of the edge tile (tests padding)

    rng = jax.random.PRNGKey(0)
    r_key, r_val, r_q0, r_q1, r_dst = jax.random.split(rng, 5)

    key_fused = jax.random.normal(r_key, (N_EDGES, KEY_CHANNELS, MK_SUM), jnp.float32)
    value_fused = jax.random.normal(r_val, (N_EDGES, VALUE_CHANNELS, M_SUM), jnp.float32)
    query = {
        "0": jax.random.normal(r_q0, (N_NODES, KEY_CHANNELS, degree_to_dim(0)), jnp.float32),
        "1": jax.random.normal(r_q1, (N_NODES, KEY_CHANNELS, degree_to_dim(1)), jnp.float32),
    }
    dst = jax.random.randint(r_dst, (N_EDGES,), 0, N_NODES, dtype=jnp.int32)

    out = attention_se3_forward(
        value_fused, key_fused, query, dst,
        num_nodes=N_NODES, num_heads=NUM_HEADS,
        key_degrees=KEY_DEGREES, key_num_features=KEY_NUM_FEATURES,
        value_degrees=VALUE_DEGREES)
    out = jax.tree_util.tree_map(jax.block_until_ready, out)

    # Correctness check against a segment-op reference (bf16 inputs, f32 math).
    # Tolerance covers bf16 rounding of the softmax weights, weighted values,
    # folded scale and denominator on the MXU paths (intentional trade-off).
    key_flat = key_fused.reshape(N_EDGES, -1)
    q_cat = jnp.concatenate([query[str(d)] for d in KEY_DEGREES], axis=-1)
    query_flat = q_cat.reshape(N_NODES, -1)
    value_flat = value_fused.reshape(N_EDGES, -1)
    ref = _reference(key_flat, query_flat, value_flat, dst,
                     num_heads=NUM_HEADS, key_num_features=KEY_NUM_FEATURES,
                     num_nodes=N_NODES).reshape(N_NODES, VALUE_CHANNELS, M_SUM)
    dims = [degree_to_dim(d) for d in VALUE_DEGREES]
    ref_parts = jnp.split(ref, list(np.cumsum(dims)[:-1]), axis=-1)
    for d, ref_p in zip(VALUE_DEGREES, ref_parts):
        np.testing.assert_allclose(np.asarray(out[str(d)]), np.asarray(ref_p),
                                   rtol=2.5e-2, atol=2.5e-2)

    print("KERNEL_OK")
</pallas_src>

<mosaic_0001>
module attributes {stable_mosaic.version = 11 : i64} {
  func.func @_attention_se3_kernel(%arg0: i32, %arg1: i32, %arg2: memref<1xi32, #tpu.memory_space<smem>>, %arg3: memref<1xi32, #tpu.memory_space<smem>>, %arg4: memref<32x128xbf16, #tpu.memory_space<vmem>>, %arg5: memref<32x128xbf16, #tpu.memory_space<vmem>>, %arg6: memref<32x128xbf16, #tpu.memory_space<vmem>>, %arg7: memref<128x128xbf16, #tpu.memory_space<vmem>>, %arg8: memref<128x2xbf16, #tpu.memory_space<vmem>>, %arg9: memref<2x128xbf16, #tpu.memory_space<vmem>>, %arg10: memref<128x128xbf16, #tpu.memory_space<vmem>>, %arg11: memref<128x128xf32, #tpu.memory_space<vmem>>, %arg12: memref<1x2xf32, #tpu.memory_space<vmem>>) attributes {dimension_semantics = [#tpu.dimension_semantics<parallel>, #tpu.dimension_semantics<arbitrary>], iteration_bounds = array<i64: 1, 1>, scalar_prefetch = 2 : i64, scratch_operands = 1 : i64, tpu.core_type = #tpu.core_type<tc>, window_params = [{transform_indices = @transform_0, window_bounds = array<i64: 32, 128>}, {transform_indices = @transform_1, window_bounds = array<i64: 32, 128>}, {transform_indices = @transform_2, window_bounds = array<i64: 32, 128>}, {transform_indices = @transform_3, window_bounds = array<i64: 128, 128>}, {pipeline_mode = #tpu.pipeline_mode<synchronous>, transform_indices = @transform_4, window_bounds = array<i64: 128, 2>}, {pipeline_mode = #tpu.pipeline_mode<synchronous>, transform_indices = @transform_5, window_bounds = array<i64: 2, 128>}, {pipeline_mode = #tpu.pipeline_mode<synchronous>, transform_indices = @transform_6, window_bounds = array<i64: 128, 128>}, {transform_indices = @transform_7, window_bounds = array<i64: 128, 128>}]} {
    %c0_i32 = arith.constant 0 : i32
    %0 = arith.cmpi eq, %arg1, %c0_i32 : i32
    %1 = arith.extui %0 : i1 to i32
    %c0_i32_0 = arith.constant 0 : i32
    %2 = arith.cmpi ne, %1, %c0_i32_0 : i32
    scf.if %2 {
      %cst = arith.constant -1.000000e+30 : f32
      %11 = vector.broadcast %cst : f32 to vector<1x2xf32>
      %c0 = arith.constant 0 : index
      %c0_4 = arith.constant 0 : index
      %12 = vector.load %arg12[%c0, %c0_4] : memref<1x2xf32, #tpu.memory_space<vmem>>, vector<1x2xf32>
      tpu.vector_store %arg12[%c0, %c0_4], %11 {strides = array<i32>} : memref<1x2xf32, #tpu.memory_space<vmem>>, vector<1x2xf32>,
      %cst_5 = arith.constant 0.000000e+00 : f32
      %13 = vector.broadcast %cst_5 : f32 to vector<128x128xf32>
      %c0_6 = arith.constant 0 : index
      %c0_7 = arith.constant 0 : index
      %14 = vector.load %arg11[%c0_6, %c0_7] : memref<128x128xf32, #tpu.memory_space<vmem>>, vector<128x128xf32>
      tpu.vector_store %arg11[%c0_6, %c0_7], %13 {strides = array<i32>} : memref<128x128xf32, #tpu.memory_space<vmem>>, vector<128x128xf32>,
    } else {
    }
    %3 = arith.index_cast %arg0 : i32 to index
    %4 = memref.load %arg3[%3] : memref<1xi32, #tpu.memory_space<smem>>
    %5 = arith.cmpi slt, %arg1, %4 : i32
    %6 = arith.extui %5 : i1 to i32
    %c0_i32_1 = arith.constant 0 : i32
    %7 = arith.cmpi ne, %6, %c0_i32_1 : i32
    scf.if %7 {
      %c0 = arith.constant 0 : index
      %c0_4 = arith.constant 0 : index
      %11 = vector.load %arg6[%c0, %c0_4] : memref<32x128xbf16, #tpu.memory_space<vmem>>, vector<32x128xbf16>
      %c0_5 = arith.constant 0 : index
      %c0_6 = arith.constant 0 : index
      %12 = vector.load %arg4[%c0_5, %c0_6] : memref<32x128xbf16, #tpu.memory_space<vmem>>, vector<32x128xbf16>
      %c0_7 = arith.constant 0 : index
      %c0_8 = arith.constant 0 : index
      %13 = vector.load %arg5[%c0_7, %c0_8] : memref<32x128xbf16, #tpu.memory_space<vmem>>, vector<32x128xbf16>
      %c0_9 = arith.constant 0 : index
      %c0_10 = arith.constant 0 : index
      %14 = vector.load %arg7[%c0_9, %c0_10] : memref<128x128xbf16, #tpu.memory_space<vmem>>, vector<128x128xbf16>
      %c0_11 = arith.constant 0 : index
      %c0_12 = arith.constant 0 : index
      %15 = vector.load %arg8[%c0_11, %c0_12] : memref<128x2xbf16, #tpu.memory_space<vmem>>, vector<128x2xbf16>
      %c0_13 = arith.constant 0 : index
      %c0_14 = arith.constant 0 : index
      %16 = vector.load %arg9[%c0_13, %c0_14] : memref<2x128xbf16, #tpu.memory_space<vmem>>, vector<2x128xbf16>
      %cst = arith.constant dense<0.000000e+00> : vector<32x128xf32>
      %17 = tpu.matmul %11, %14, %cst {dimension_numbers = #tpu.dot_dimension_numbers<[1], [0], [0], [1], [0, 0, 1, 1], [], []>} : vector<32x128xbf16>, vector<128x128xbf16>, vector<32x128xf32> -> vector<32x128xf32>
      %18 = arith.extf %12 : vector<32x128xbf16> to vector<32x128xf32>
      %19 = arith.mulf %18, %17 : vector<32x128xf32>
      %20 = arith.truncf %19 : vector<32x128xf32> to vector<32x128xbf16>
      %cst_15 = arith.constant dense<0.000000e+00> : vector<32x2xf32>
      %21 = tpu.matmul %20, %15, %cst_15 {dimension_numbers = #tpu.dot_dimension_numbers<[1], [0], [0], [1], [0, 0, 1, 1], [], []>} : vector<32x128xbf16>, vector<128x2xbf16>, vector<32x2xf32> -> vector<32x2xf32>
      %22 = arith.extf %11 : vector<32x128xbf16> to vector<32x128xf32>
      %cst_16 = arith.constant dense<0.000000e+00> : vector<32xf32>
      %23 = vector.multi_reduction <add>, %22, %cst_16 [1] : vector<32x128xf32> to vector<32xf32>
      %24 = vector.shape_cast %23 : vector<32xf32> to vector<32x1xf32>
      %cst_17 = arith.constant 5.000000e-01 : f32
      %25 = vector.broadcast %cst_17 : f32 to vector<32x1xf32>
      %26 = arith.cmpf ogt, %24, %25 : vector<32x1xf32>
      %cst_18 = arith.constant -1.000000e+30 : f32
      %27 = vector.shape_cast %26 : vector<32x1xi1> to vector<32x1xi1>
      %28 = vector.broadcast %27 : vector<32x1xi1> to vector<32x2xi1>
      %29 = vector.broadcast %cst_18 : f32 to vector<32x2xf32>
      %30 = arith.select %28, %21, %29 : vector<32x2xi1>, vector<32x2xf32>
      %c0_19 = arith.constant 0 : index
      %c0_20 = arith.constant 0 : index
      %31 = vector.load %arg12[%c0_19, %c0_20] : memref<1x2xf32, #tpu.memory_space<vmem>>, vector<1x2xf32>
      %cst_21 = arith.constant dense<0xFF800000> : vector<2xf32>
      %32 = vector.multi_reduction <maximumf>, %30, %cst_21 [0] : vector<32x2xf32> to vector<2xf32>
      %33 = vector.shape_cast %32 : vector<2xf32> to vector<1x2xf32>
      %34 = arith.maximumf %31, %33 : vector<1x2xf32>
      %c0_22 = arith.constant 0 : index
      %c0_23 = arith.constant 0 : index
      %35 = vector.load %arg12[%c0_22, %c0_23] : memref<1x2xf32, #tpu.memory_space<vmem>>, vector<1x2xf32>
      tpu.vector_store %arg12[%c0_22, %c0_23], %34 {strides = array<i32>} : memref<1x2xf32, #tpu.memory_space<vmem>>, vector<1x2xf32>,
      %36 = vector.broadcast %34 : vector<1x2xf32> to vector<32x2xf32>
      %37 = arith.subf %30, %36 : vector<32x2xf32>
      %38 = math.exp %37 : vector<32x2xf32>
      %39 = arith.truncf %38 : vector<32x2xf32> to vector<32x2xbf16>
      %cst_24 = arith.constant dense<0.000000e+00> : vector<32x128xf32>
      %40 = tpu.matmul %39, %16, %cst_24 {dimension_numbers = #tpu.dot_dimension_numbers<[1], [0], [0], [1], [0, 0, 1, 1], [], []>} : vector<32x2xbf16>, vector<2x128xbf16>, vector<32x128xf32> -> vector<32x128xf32>
      %41 = arith.extf %13 : vector<32x128xbf16> to vector<32x128xf32>
      %42 = arith.mulf %40, %41 : vector<32x128xf32>
      %43 = arith.truncf %42 : vector<32x128xf32> to vector<32x128xbf16>
      %cst_25 = arith.constant dense<0.000000e+00> : vector<128x128xf32>
      %44 = tpu.matmul %11, %43, %cst_25 {dimension_numbers = #tpu.dot_dimension_numbers<[0], [0], [1], [1], [0, 1, 1, 1], [], []>} : vector<32x128xbf16>, vector<32x128xbf16>, vector<128x128xf32> -> vector<128x128xf32>
      %45 = arith.subf %31, %34 : vector<1x2xf32>
      %46 = math.exp %45 : vector<1x2xf32>
      %47 = arith.truncf %46 : vector<1x2xf32> to vector<1x2xbf16>
      %cst_26 = arith.constant dense<0.000000e+00> : vector<1x128xf32>
      %48 = tpu.matmul %47, %16, %cst_26 {dimension_numbers = #tpu.dot_dimension_numbers<[1], [0], [0], [1], [0, 0, 1, 1], [], []>} : vector<1x2xbf16>, vector<2x128xbf16>, vector<1x128xf32> -> vector<1x128xf32>
      %c0_27 = arith.constant 0 : index
      %c0_28 = arith.constant 0 : index
      %49 = vector.load %arg11[%c0_27, %c0_28] : memref<128x128xf32, #tpu.memory_space<vmem>>, vector<128x128xf32>
      %50 = vector.broadcast %48 : vector<1x128xf32> to vector<128x128xf32>
      %51 = arith.mulf %49, %50 : vector<128x128xf32>
      %52 = arith.addf %51, %44 : vector<128x128xf32>
      %c0_29 = arith.constant 0 : index
      %c0_30 = arith.constant 0 : index
      %53 = vector.load %arg11[%c0_29, %c0_30] : memref<128x128xf32, #tpu.memory_space<vmem>>, vector<128x128xf32>
      tpu.vector_store %arg11[%c0_29, %c0_30], %52 {strides = array<i32>} : memref<128x128xf32, #tpu.memory_space<vmem>>, vector<128x128xf32>,
    } else {
    }
    %c0_i32_2 = arith.constant 0 : i32
    %8 = arith.cmpi eq, %arg1, %c0_i32_2 : i32
    %9 = arith.extui %8 : i1 to i32
    %c0_i32_3 = arith.constant 0 : i32
    %10 = arith.cmpi ne, %9, %c0_i32_3 : i32
    scf.if %10 {
      %c0 = arith.constant 0 : index
      %c0_4 = arith.constant 0 : index
      %11 = vector.load %arg11[%c0, %c0_4] : memref<128x128xf32, #tpu.memory_space<vmem>>, vector<128x128xf32>
      %12 = arith.truncf %11 : vector<128x128xf32> to vector<128x128xbf16>
      %c0_5 = arith.constant 0 : index
      %c0_6 = arith.constant 0 : index
      %13 = vector.load %arg10[%c0_5, %c0_6] : memref<128x128xbf16, #tpu.memory_space<vmem>>, vector<128x128xbf16>
      %cst = arith.constant dense<0.000000e+00> : vector<128x128xf32>
      %14 = tpu.matmul %12, %13, %cst {dimension_numbers = #tpu.dot_dimension_numbers<[1], [0], [0], [1], [0, 0, 1, 1], [], []>} : vector<128x128xbf16>, vector<128x128xbf16>, vector<128x128xf32> -> vector<128x128xf32>
      %cst_7 = arith.constant 0.000000e+00 : f32
      %15 = vector.broadcast %cst_7 : f32 to vector<128x128xf32>
      %16 = arith.cmpf ogt, %14, %15 : vector<128x128xf32>
      %cst_8 = arith.constant 1.000000e+00 : f32
      %17 = vector.broadcast %cst_8 : f32 to vector<128x128xf32>
      %18 = arith.select %16, %14, %17 : vector<128x128xi1>, vector<128x128xf32>
      %19 = tpu.reciprocal %18 {approx = true} : vector<128x128xf32> -> vector<128x128xf32>
      %20 = arith.mulf %18, %19 : vector<128x128xf32>
      %cst_9 = arith.constant 2.000000e+00 : f32
      %21 = vector.broadcast %cst_9 : f32 to vector<128x128xf32>
      %22 = arith.subf %21, %20 : vector<128x128xf32>
      %23 = arith.mulf %19, %22 : vector<128x128xf32>
      %cst_10 = arith.constant 0.000000e+00 : f32
      %24 = vector.broadcast %cst_10 : f32 to vector<128x128xf32>
      %25 = arith.cmpf ogt, %14, %24 : vector<128x128xf32>
      %cst_11 = arith.constant 0.000000e+00 : f32
      %26 = vector.broadcast %cst_11 : f32 to vector<128x128xf32>
      %27 = arith.select %25, %23, %26 : vector<128x128xi1>, vector<128x128xf32>
      %28 = arith.mulf %11, %27 : vector<128x128xf32>
      %c0_12 = arith.constant 0 : index
      %c0_13 = arith.constant 0 : index
      %29 = vector.load %arg11[%c0_12, %c0_13] : memref<128x128xf32, #tpu.memory_space<vmem>>, vector<128x128xf32>
      tpu.vector_store %arg11[%c0_12, %c0_13], %28 {strides = array<i32>} : memref<128x128xf32, #tpu.memory_space<vmem>>, vector<128x128xf32>,
    } else {
    }
    return
  }
  func.func @transform_0(%arg0: i32, %arg1: i32, %arg2: memref<1xi32, #tpu.memory_space<smem>>, %arg3: memref<1xi32, #tpu.memory_space<smem>>) -> (i32, i32) {
    %0 = arith.index_cast %arg0 : i32 to index
    %1 = memref.load %arg3[%0] : memref<1xi32, #tpu.memory_space<smem>>
    %c1_i32 = arith.constant 1 : i32
    %2 = arith.subi %1, %c1_i32 : i32
    %c0_i32 = arith.constant 0 : i32
    %3 = arith.maxsi %2, %c0_i32 : i32
    %4 = arith.index_cast %arg0 : i32 to index
    %5 = memref.load %arg2[%4] : memref<1xi32, #tpu.memory_space<smem>>
    %6 = arith.minsi %arg1, %3 : i32
    %7 = arith.addi %5, %6 : i32
    %c0_i32_0 = arith.constant 0 : i32
    %c0_i32_1 = arith.constant 0 : i32
    return %7, %c0_i32_0 : i32, i32
  }
  func.func @transform_1(%arg0: i32, %arg1: i32, %arg2: memref<1xi32, #tpu.memory_space<smem>>, %arg3: memref<1xi32, #tpu.memory_space<smem>>) -> (i32, i32) {
    %0 = arith.index_cast %arg0 : i32 to index
    %1 = memref.load %arg3[%0] : memref<1xi32, #tpu.memory_space<smem>>
    %c1_i32 = arith.constant 1 : i32
    %2 = arith.subi %1, %c1_i32 : i32
    %c0_i32 = arith.constant 0 : i32
    %3 = arith.maxsi %2, %c0_i32 : i32
    %4 = arith.index_cast %arg0 : i32 to index
    %5 = memref.load %arg2[%4] : memref<1xi32, #tpu.memory_space<smem>>
    %6 = arith.minsi %arg1, %3 : i32
    %7 = arith.addi %5, %6 : i32
    %c0_i32_0 = arith.constant 0 : i32
    %c0_i32_1 = arith.constant 0 : i32
    return %7, %c0_i32_0 : i32, i32
  }
  func.func @transform_2(%arg0: i32, %arg1: i32, %arg2: memref<1xi32, #tpu.memory_space<smem>>, %arg3: memref<1xi32, #tpu.memory_space<smem>>) -> (i32, i32) {
    %0 = arith.index_cast %arg0 : i32 to index
    %1 = memref.load %arg3[%0] : memref<1xi32, #tpu.memory_space<smem>>
    %c1_i32 = arith.constant 1 : i32
    %2 = arith.subi %1, %c1_i32 : i32
    %c0_i32 = arith.constant 0 : i32
    %3 = arith.maxsi %2, %c0_i32 : i32
    %4 = arith.index_cast %arg0 : i32 to index
    %5 = memref.load %arg2[%4] : memref<1xi32, #tpu.memory_space<smem>>
    %6 = arith.minsi %arg1, %3 : i32
    %7 = arith.addi %5, %6 : i32
    %c0_i32_0 = arith.constant 0 : i32
    %c0_i32_1 = arith.constant 0 : i32
    return %7, %c0_i32_0 : i32, i32
  }
  func.func @transform_3(%arg0: i32, %arg1: i32, %arg2: memref<1xi32, #tpu.memory_space<smem>>, %arg3: memref<1xi32, #tpu.memory_space<smem>>) -> (i32, i32) {
    %c0_i32 = arith.constant 0 : i32
    %c0_i32_0 = arith.constant 0 : i32
    return %arg0, %c0_i32 : i32, i32
  }
  func.func @transform_4(%arg0: i32, %arg1: i32, %arg2: memref<1xi32, #tpu.memory_space<smem>>, %arg3: memref<1xi32, #tpu.memory_space<smem>>) -> (i32, i32) {
    %c0_i32 = arith.constant 0 : i32
    %c0_i32_0 = arith.constant 0 : i32
    %c0_i32_1 = arith.constant 0 : i32
    return %c0_i32, %c0_i32_0 : i32, i32
  }
  func.func @transform_5(%arg0: i32, %arg1: i32, %arg2: memref<1xi32, #tpu.memory_space<smem>>, %arg3: memref<1xi32, #tpu.memory_space<smem>>) -> (i32, i32) {
    %c0_i32 = arith.constant 0 : i32
    %c0_i32_0 = arith.constant 0 : i32
    %c0_i32_1 = arith.constant 0 : i32
    return %c0_i32, %c0_i32_0 : i32, i32
  }
  func.func @transform_6(%arg0: i32, %arg1: i32, %arg2: memref<1xi32, #tpu.memory_space<smem>>, %arg3: memref<1xi32, #tpu.memory_space<smem>>) -> (i32, i32) {
    %c0_i32 = arith.constant 0 : i32
    %c0_i32_0 = arith.constant 0 : i32
    %c0_i32_1 = arith.constant 0 : i32
    return %c0_i32, %c0_i32_0 : i32, i32
  }
  func.func @transform_7(%arg0: i32, %arg1: i32, %arg2: memref<1xi32, #tpu.memory_space<smem>>, %arg3: memref<1xi32, #tpu.memory_space<smem>>) -> (i32, i32) {
    %c0_i32 = arith.constant 0 : i32
    %c0_i32_0 = arith.constant 0 : i32
    return %arg0, %c0_i32 : i32, i32
  }
}

</mosaic_0001>

<bundles_post_ra>
// kernel: tpu_custom_call.1
= control target key start
LH: loop header
LB: loop body
LE: loop exit
PB: predicated region body
PF: predicated region fallthrough
CT: control target
= control target key end

     0   :  { %16 = vsyncpa [#allocation7], 0  ;;  %s2115_s0 = inlined_call_operand.<no memory space> [shape: s32[1], index: 0, kind: input, shape index: {}]   ;;  %s2116_s1 = inlined_call_operand.<no memory space> [shape: s32[1], index: 1, kind: input, shape index: {}]   ;;  %s2117_s2 = inlined_call_operand.vmem [shape: bf16[32,128], index: 2, kind: input, shape index: {}]   ;;  %s2118_s3 = inlined_call_operand.hbm [shape: bf16[32,128], index: 3, kind: input, shape index: {}]   ;;  %s2119_s4 = inlined_call_operand.hbm [shape: bf16[32,128], index: 4, kind: input, shape index: {}]   ;;  %s2120_s5 = inlined_call_operand.vmem [shape: bf16[128,128], index: 5, kind: input, shape index: {}]   ;;  %s2121_s6 = inlined_call_operand.vmem [shape: bf16[128,2], index: 6, kind: input, shape index: {}]   ;;  %s2122_s7 = inlined_call_operand.vmem [shape: bf16[2,128], index: 7, kind: input, shape index: {}]   ;;  %s2123_s8 = inlined_call_operand.hbm [shape: bf16[128,128], index: 8, kind: input, shape index: {}]   ;;  %s2124_s9 = inlined_call_operand.hbm [shape: f32[128,128], index: 9, kind: output, shape index: {}]  }
   0x1   :  { %17 = vsyncpa [#allocation10], 0  ;;  %s1208_s11 = sadd.s32 4294967295, %s2116_s1 }
   0x2   :  { %18 = vsyncpa [#allocation8], 0  ;;  %p47_p0 = scmp.gt.s32.totalorder %s1208_s11, 0  ;;  %s1645_s12 = smov [#allocation9]  }
   0x3   :  { %s82_s13 = sshll.u32 %s1645_s12, 4  ;;  %s1646_s14 = smov [#allocation6]   ;;  %s1710_s13 = int_to_ptr.vmem [resolvable:$true] %s82_s13 }
   0x4   :  { %s2139_s11 = smov (!%p47_p0, %s1208_s11), 0  ;;  %s59_s15 = sshll.u32 %s1646_s14, 4  ;;  %s1712_s15 = int_to_ptr.vmem [resolvable:$true] %s59_s15 }
   0x5   :  { %s2141_s11 = smov (%p47_p0, %s2139_s11), 0  ;;  %s1647_s20 = smov [#allocation11]  }
   0x6   :  { %s1717_s18 = sadd.s32 %s2141_s11, %s2115_s0  ;;  %s1720_s21 = sshll.u32 %s1647_s20, 4  ;;  %s101_s21 = int_to_ptr.vmem [resolvable:$true] %s1720_s21 }
   0x7   :  { %s1262_s19 = sshll.u32 %s1717_s18, 8  ;;  %s1549_s0 = scalar_lea.hbm %s2119_s4, 256 }
   0x8   :  { %s81_s24 = scalar_lea.hbm %s2119_s4, %s1262_s19  ;;  %s1728_s27 = scalar_lea.hbm %s2118_s3, %s1262_s19 }
   0x9   :  { %s1547_s28 = scalar_lea.hbm %s81_s24, 256  ;;  %p1550_p2 = scmp.lt.u32.totalorder %s81_s24, %s2119_s4 }
   0xa   :  { %p1548_p1 = scmp.ne.s32.totalorder %s81_s24, %s1547_s28  ;;  %p1551_p3 = scmp.lt.u32.totalorder %s1549_s0, %s1547_s28 }
   0xb   :  { %p1553_p5 = scmp.lt.u32.totalorder %s1547_s28, %s81_s24 }
   0xc   :  { %p1552_p4 = por %p1551_p3, %p1550_p2 }
   0xe   :  { %p1554_p6 = por %p1553_p5, %p1552_p4 }
  0x10   :  { %p1555_p7 = pnand %p1554_p6, %p1548_p1 }
  0x12   :  { %1558 = shalt.err (!%p1555_p7)
}
  0x13   :  { %s1559_s12 = scalar_lea.vmem %s1710_s13, 256  ;;  %p1564_p9 = scmp.lt.s32.totalorder %s1710_s13, %s1710_s13 }
  0x14   :  { %p1560_p8 = scmp.ne.s32.totalorder %s1710_s13, %s1559_s12  ;;  %p1565_p10 = scmp.lt.s32.totalorder %s1559_s12, %s1559_s12 }
  0x16   :  { %p1566_p11 = por %p1565_p10, %p1564_p9 }
  0x18   :  { %p1567_p12 = pnand %p1566_p11, %p1560_p8 }
  0x1a   :  { %1570 = shalt.err (!%p1567_p12)
}
  0x1b   :  { %s1648_s14 = smov 64   ;;  %s1649_s4 = smov 4  }
  0x1c   :  { %88 = dma.hbm_to_vmem [thread:$0]  %s81_s24, 256, %s1710_s13, [#allocation10], %s1648_s14, %s1648_s14, %s1649_s4  }
  0x1d   :  { %s1571_s16 = scalar_lea.hbm %s1728_s27, 256  ;;  %s1573_s20 = scalar_lea.hbm %s2118_s3, 256 }
  0x1e   :  { %p1572_p13 = scmp.ne.s32.totalorder %s1728_s27, %s1571_s16  ;;  %p1574_p0 = scmp.lt.u32.totalorder %s1728_s27, %s2118_s3 }
  0x1f   :  { %p1575_p1 = scmp.lt.u32.totalorder %s1573_s20, %s1571_s16  ;;  %p1577_p3 = scmp.lt.u32.totalorder %s1571_s16, %s1728_s27 }
  0x21   :  { %p1576_p2 = por %p1575_p1, %p1574_p0 }
  0x23   :  { %p1578_p4 = por %p1577_p3, %p1576_p2 }
  0x25   :  { %p1579_p5 = pnand %p1578_p4, %p1572_p13 }
  0x27   :  { %1582 = shalt.err (!%p1579_p5)
}
  0x28   :  { %s1583_s13 = scalar_lea.vmem %s1712_s15, 256  ;;  %p1588_p7 = scmp.lt.s32.totalorder %s1712_s15, %s1712_s15 }
  0x29   :  { %p1584_p6 = scmp.ne.s32.totalorder %s1712_s15, %s1583_s13  ;;  %p1589_p8 = scmp.lt.s32.totalorder %s1583_s13, %s1583_s13 }
  0x2b   :  { %p1590_p9 = por %p1589_p8, %p1588_p7 }
  0x2d   :  { %p1591_p10 = pnand %p1590_p9, %p1584_p6 }
  0x2f   :  { %1594 = shalt.err (!%p1591_p10)
}
  0x30   :  { %65 = dma.hbm_to_vmem [thread:$0]  %s1728_s27, 256, %s1712_s15, [#allocation7], %s1648_s14, %s1648_s14, %s1649_s4  }
  0x31   :  { %s1595_s25 = scalar_lea.hbm %s2123_s8, 1024 }
  0x32   :  { %p1596_p11 = scmp.ne.s32.totalorder %s2123_s8, %s1595_s25  ;;  %p1599_p12 = scmp.lt.u32.totalorder %s1595_s25, %s2123_s8 }
  0x34   :  { %p1601_p13 = pnand %p1599_p12, %p1596_p11 }
  0x36   :  { %1604 = shalt.err (!%p1601_p13)
}
  0x37   :  { %s1605_s0 = scalar_lea.vmem %s101_s21, 1024  ;;  %p1610_p1 = scmp.lt.s32.totalorder %s101_s21, %s101_s21 }
  0x38   :  { %p1606_p0 = scmp.ne.s32.totalorder %s101_s21, %s1605_s0  ;;  %p1611_p2 = scmp.lt.s32.totalorder %s1605_s0, %s1605_s0 }
  0x3a   :  { %p1612_p3 = por %p1611_p2, %p1610_p1 }
  0x3c   :  { %p1613_p4 = pnand %p1612_p3, %p1606_p0 }
  0x3e   :  { %1616 = shalt.err (!%p1613_p4)
}
  0x3f   :  { %106 = dma.hbm_to_vmem [thread:$0]  %s2123_s8, 1024, %s101_s21, [#allocation10], %s1648_s14, %s1648_s14, %s1649_s4  }
  0x40   :  { %1639 = dma.done.wait [#allocation7], 256  }
  0x41   :  { %1640 = vsyncadd [#allocation7], 4294967040 }
  0x42   :  { %1641 = dma.done.wait [#allocation10], 1280  }
  0x43   :  { %1642 = vsyncadd [#allocation10], 4294966016  ;;  %s1218_s10 = sshll.u32 %s1717_s18, 2  ;;  %vm174_vm0 = vcmask 8192   ;;  %v1650_v0 = vmov -1e+30  }
  0x44   :  { %p1780_p5 = scmp.lt.s32.totalorder %s1218_s10, 3  ;;  %175 = vst.msk [vmem:[#allocation2] sm:$0x1] %vm174_vm0, %v1650_v0  ;;  %v1651_v1 = vmov 0.0   ;;  %p1221_p6 = scmp.le.s32.totalorder %s2116_s1, 0 }
  0x45   :  { %176 = vst [vmem:[#allocation12] sm:$0xff] %v1651_v1  ;;  %177 = vst [vmem:[#allocation12 + $0x8] sm:$0xff] %v1651_v1  ;;  %v1477_v2 = vld [vmem:[%s2120_s5] sm:$0xff] (!%p1221_p6)   ;;  %v1478_v3 = vld [vmem:[%s2120_s5 + $0x8] sm:$0xff] (!%p1221_p6)   ;;  %vm530_vm1 = vcmask (!%p1221_p6), 1040384   ;;  %vm487_vm5 = vcmask (!%p1221_p6), 15360   ;;  %v505_v63 = vlaneseq (!%p1221_p6) }
  0x46   :  { %178 = vst [vmem:[#allocation12 + $0x10] sm:$0xff] %v1651_v1  ;;  %179 = vst [vmem:[#allocation12 + $0x18] sm:$0xff] %v1651_v1  ;;  %s2143_s10 = smov (!%p1780_p5, %s1218_s10), 3  ;;  %196 = sbr.rel (%p1221_p6) target bundleno = 1043 (0x413), region = 49 }
  0x47   :  { %180 = vst [vmem:[#allocation12 + $0x20] sm:$0xff] %v1651_v1  ;;  %181 = vst [vmem:[#allocation12 + $0x28] sm:$0xff] %v1651_v1  ;;  %s1219_s8 = sshll.u32 %s2143_s10, 2  ;;  %1339 = vmatprep.subr.bf16.mxu0 (!%p1221_p6), %v1477_v2  ;;  %v1479_v4 = vld [vmem:[%s2120_s5 + $0x10] sm:$0xff] (!%p1221_p6)   ;;  %v1480_v5 = vld [vmem:[%s2120_s5 + $0x18] sm:$0xff] (!%p1221_p6)   ;;  %vm609_vm7 = vcmask (!%p1221_p6), 261120  }
  0x48   :  { %182 = vst [vmem:[#allocation12 + $0x30] sm:$0xff] %v1651_v1  ;;  %183 = vst [vmem:[#allocation12 + $0x38] sm:$0xff] %v1651_v1  ;;  %s1790_s12 = scalar_lea.vmem %s2117_s2, %s1219_s8  ;;  %1340 = vmatpush3.bf16.msra.mxu0 (!%p1221_p6), %v1477_v2  ;;  %v197_v6 = vld [vmem:[#allocation9] sm:$0xff] (!%p1221_p6)   ;;  %v1487_v7 = vld [vmem:[%s2121_s6] sm:$0xff] (!%p1221_p6)   ;;  %v1855_v2 = vshrl.u32 (!%p1221_p6), %v505_v63, 7  ;;  %vm1653_vm8 = vmmov (!%p1221_p6), 0  }
  0x49   :  { %184 = vst [vmem:[#allocation12 + $0x40] sm:$0xff] %v1651_v1  ;;  %185 = vst [vmem:[#allocation12 + $0x48] sm:$0xff] %v1651_v1  ;;  %1341 = vmatprep.subr.bf16.mxu0 (!%p1221_p6), %v1478_v3  ;;  %v1488_v8 = vld [vmem:[%s2121_s6 + $0x8] sm:$0xff] (!%p1221_p6)   ;;  %1355 = vmatprep.mubr.bf16.mxu0 (!%p1221_p6), %v197_v6  ;;  %v1481_v9 = vld [vmem:[%s2120_s5 + $0x20] sm:$0xff] (!%p1221_p6)   ;;  %v458_v21 = vunpack.c.l.bf16 (!%p1221_p6), %v197_v6  ;;  %v459_v23 = vunpack.c.h.bf16 (!%p1221_p6), %v197_v6 }
  0x4a   :  { %186 = vst [vmem:[#allocation12 + $0x50] sm:$0xff] %v1651_v1  ;;  %187 = vst [vmem:[#allocation12 + $0x58] sm:$0xff] %v1651_v1  ;;  %1359 = vmatprep.subr.bf16.mxu1 (!%p1221_p6), %v1487_v7  ;;  %v1489_v10 = vld [vmem:[%s2121_s6 + $0x10] sm:$0xff] (!%p1221_p6)   ;;  %v1482_v11 = vld [vmem:[%s2120_s5 + $0x28] sm:$0xff] (!%p1221_p6)  }
  0x4b   :  { %188 = vst [vmem:[#allocation12 + $0x60] sm:$0xff] %v1651_v1  ;;  %189 = vst [vmem:[#allocation12 + $0x68] sm:$0xff] %v1651_v1  ;;  %1360 = vmatpush3.bf16.msra.mxu1 (!%p1221_p6), %v1487_v7  ;;  %v1490_v12 = vld [vmem:[%s2121_s6 + $0x18] sm:$0xff] (!%p1221_p6)   ;;  %v1483_v13 = vld [vmem:[%s2120_s5 + $0x30] sm:$0xff] (!%p1221_p6)   ;;  %462 = vadd.xlane.f32.xlu0 (!%p1221_p6), %v458_v21 }
  0x4c   :  { %190 = vst [vmem:[#allocation12 + $0x70] sm:$0xff] %v1651_v1  ;;  %191 = vst [vmem:[#allocation12 + $0x78] sm:$0xff] %v1651_v1  ;;  %1342 = vmatpush3.bf16.msra.mxu0 (!%p1221_p6), %v1478_v3  ;;  %1361 = vmatprep.subr.bf16.mxu1 (!%p1221_p6), %v1488_v8  ;;  %v1491_v14 = vld [vmem:[%s2121_s6 + $0x20] sm:$0xff] (!%p1221_p6)   ;;  %v1484_v15 = vld [vmem:[%s2120_s5 + $0x38] sm:$0xff] (!%p1221_p6)  }
  0x4d   :  { %1343 = vmatprep.subr.bf16.mxu0 %v1479_v4  ;;  %v1492_v16 = vld [vmem:[%s2121_s6 + $0x28] sm:$0xff]   ;;  %v199_v17 = vld [vmem:[#allocation9 + $0x8] sm:$0xff]   ;;  %v1493_v18 = vld [vmem:[%s2121_s6 + $0x30] sm:$0xff]  }
  0x4e   :  { %v1494_v19 = vld [vmem:[%s2121_s6 + $0x38] sm:$0xff]   ;;  %v460_v20 = vunpack.c.l.bf16 %v199_v17  ;;  %v461_v22 = vunpack.c.h.bf16 %v199_v17  ;;  %v1286_v24 = vld [vmem:[%s1790_s12 + $0x8] sm:$0xff]   ;;  %v1271_v25 = vld [vmem:[%s1790_s12] sm:$0xff]  }
  0x4f   :  { %1362 = vmatpush3.bf16.msra.mxu1 %v1488_v8  ;;  %464 = vadd.xlane.f32.xlu0 %v459_v23  ;;  %v1276_v26 = vunpack.c.l.bf16 %v1286_v24  ;;  %v1277_v27 = vunpack.c.h.bf16 %v1286_v24  ;;  %v1272_v29 = vunpack.c.l.bf16 %v1271_v25  ;;  %v1273_v30 = vunpack.c.h.bf16 %v1271_v25  ;;  %v241_v40 = vld [vmem:[%s2122_s7] sm:$0x1] }
  0x50   :  { %1344 = vmatpush3.bf16.msra.mxu0 %v1479_v4  ;;  %1363 = vmatprep.subr.bf16.mxu1 %v1489_v10  ;;  %v1848_v41 = vsel %vm530_vm1, %v241_v40, 0  ;;  %v486_v4 = vld [vmem:[#allocation2] sm:$0x1] }
  0x51   :  { %1345 = vmatprep.subr.bf16.mxu0 %v1480_v5  ;;  %466 = vadd.xlane.f32.xlu1 %v460_v20 }
  0x53   :  { %1364 = vmatpush3.bf16.msra.mxu1 %v1489_v10 }
  0x54   :  { %1346 = vmatpush3.bf16.msra.mxu0 %v1480_v5  ;;  %1365 = vmatprep.subr.bf16.mxu1 %v1490_v12 }
  0x55   :  { %1347 = vmatprep.subr.bf16.mxu0 %v1481_v9  ;;  %468 = vadd.xlane.f32.xlu1 %v461_v22 }
  0x57   :  { %1366 = vmatpush3.bf16.msra.mxu1 %v1490_v12 }
  0x58   :  { %1348 = vmatpush3.bf16.msra.mxu0 %v1481_v9  ;;  %1367 = vmatprep.subr.bf16.mxu1 %v1491_v14 }
  0x59   :  { %1349 = vmatprep.subr.bf16.mxu0 %v1482_v11 }
  0x5b   :  { %1368 = vmatpush3.bf16.msra.mxu1 %v1491_v14 }
  0x5c   :  { %1350 = vmatpush3.bf16.msra.mxu0 %v1482_v11  ;;  %1369 = vmatprep.subr.bf16.mxu1 %v1492_v16 }
  0x5d   :  { %1351 = vmatprep.subr.bf16.mxu0 %v1483_v13 }
  0x5f   :  { %1370 = vmatpush3.bf16.msra.mxu1 %v1492_v16 }
  0x60   :  { %1352 = vmatpush3.bf16.msra.mxu0 %v1483_v13  ;;  %1371 = vmatprep.subr.bf16.mxu1 %v1493_v18 }
  0x61   :  { %1353 = vmatprep.subr.bf16.mxu0 %v1484_v15 }
  0x63   :  { %1372 = vmatpush3.bf16.msra.mxu1 %v1493_v18 }
  0x64   :  { %1354 = vmatpush3.bf16.msra.mxu0 %v1484_v15  ;;  %1373 = vmatprep.subr.bf16.mxu1 %v1494_v19 }
  0x65   :  { %1463 = vmatprep.subr.msk.bf16.mxu0 %vm530_vm1, %v241_v40 }
  0x67   :  { %1356 = vmatmul.mubr.bf16.vlgmr.msra.gmra.mrb[0].mxu0 %v199_v17  ;;  %1374 = vmatpush3.bf16.msra.mxu1 %v1494_v19 }
  0x68   :  { %1380 = vmatpush3.bf16.msra.mxu0 %v1848_v41 }
  0x7c   :  { %593 = vxpose.xlu0.c.b16.start [1/2] (short) %v197_v6, 128  ;;  %v507_v6 = vsub.s32 0, %v1855_v2 }
  0x80   :  { %594 = vxpose.xlu0.c.b16.end [2/2] (short) %v199_v17, 128 }
  0xd8   :  { %v463_v43 = vpop.xlane.xlu0 %462 }
  0xd9   :  { %vm470_vm4 = vcmp.gt.f32.partialorder %v463_v43, 0.5 }
  0xdc   :  { %v465_v45 = vpop.xlane.xlu0 %464 }
  0xdd   :  { %vm471_vm6 = vcmp.gt.f32.partialorder %v465_v45, 0.5 }
  0xde   :  { %v467_v42 = vpop.xlane.xlu1 %466 }
  0xdf   :  { %vm472_vm2 = vcmp.gt.f32.partialorder %v467_v42, 0.5 }
  0xe2   :  { %v469_v44 = vpop.xlane.xlu1 %468  ;;  %v601_v24 = vpop.trf.xlu0 }
  0xe3   :  { %vm473_vm3 = vcmp.gt.f32.partialorder %v469_v44, 0.5 }
  0xe6   :  { %v602_v25 = vpop.trf.xlu0 }
 0x13a   :  { %v1357_v28 = vpop.f32.mrb[0].mxu0 }
 0x13b   :  { %v336_v31 = vpop.f32.mrb[1].mxu0  ;;  %v357_v33 = vmul.f32 %v1357_v28, %v1276_v26  ;;  %v603_v26 = vpop.trf.xlu0  ;;  %v1279_v28 = vld [vmem:[#allocation6] sm:$0xff]  }
 0x13c   :  { %v1358_v32 = vpop.f32.mrb[2].mxu0  ;;  %v355_v36 = vmul.f32 %v1272_v29, %v336_v31 }
 0x13d   :  { %v358_v34 = vmul.f32 %v1358_v32, %v1277_v27  ;;  %v339_v35 = vpop.f32.mrb[3].mxu0  ;;  %v1287_v27 = vld [vmem:[#allocation6 + $0x8] sm:$0xff]   ;;  %v1280_v32 = vunpack.c.l.bf16 %v1279_v28 }
 0x13e   :  { %v356_v37 = vmul.f32 %v1273_v30, %v339_v35  ;;  %v1284_v29 = vunpack.c.l.bf16 %v1287_v27  ;;  %v1285_v30 = vunpack.c.h.bf16 %v1287_v27 }
 0x13f   :  { %v360_v38 = vpack.c.bf16 %v358_v34, %v357_v33  ;;  %v1281_v33 = vunpack.c.h.bf16 %v1279_v28  ;;  %v604_v42 = vpop.trf.xlu0  ;;  %v787_v28 = vld [vmem:[#allocation12 + $0x48] sm:$0xff] }
 0x140   :  { %v359_v39 = vpack.c.bf16 %v356_v37, %v355_v36 }
 0x142   :  { %1375 = vmatprep.mubr.bf16.mxu1 %v359_v39 }
 0x143   :  { %1376 = vmatmul.mubr.bf16.vlgmr.msra.gmra.mrb[0].mxu1 %v360_v38 }
 0x144   :  { %1393 = vmatprep.mubr.msk.bf16.mxu1 %vm609_vm7, %v603_v26 }
 0x216   :  { %v1377_v46 = vpop.f32.mrb[0].mxu1 }
 0x217   :  { %v484_v47 = vsel %vm472_vm2, %v1377_v46, -1e+30  ;;  %v443_v48 = vpop.f32.mrb[1].mxu1  ;;  %v605_v46 = vpop.trf.xlu0 }
 0x218   :  { %v482_v49 = vsel %vm470_vm4, %v443_v48, -1e+30  ;;  %v1378_v50 = vpop.f32.mrb[2].mxu1  ;;  %v490_v53 = vsel %vm487_vm5, %v484_v47, -inf }
 0x219   :  { %v485_v51 = vsel %vm473_vm3, %v1378_v50, -1e+30  ;;  %v446_v52 = vpop.f32.mrb[3].mxu1  ;;  %v488_v56 = vsel %vm487_vm5, %v482_v49, -inf }
 0x21a   :  { %v491_v54 = vsel %vm487_vm5, %v485_v51, -inf  ;;  %v483_v55 = vsel %vm471_vm6, %v446_v52, -1e+30 }
 0x21b   :  { %v493_v57 = vmax.f32 %v490_v53, %v491_v54  ;;  %v489_v58 = vsel %vm487_vm5, %v483_v55, -inf  ;;  %v606_v48 = vpop.trf.xlu0 }
 0x21c   :  { %v492_v59 = vmax.f32 %v488_v56, %v489_v58 }
 0x21e   :  { %v494_v60 = vmax.f32 %v492_v59, %v493_v57 }
 0x220   :  { %v495_v61 = vrot.slane %v494_v60, 4 }
 0x222   :  { %v496_v62 = vmax.f32 %v494_v60, %v495_v61  ;;  %v778_v60 = vld [vmem:[#allocation12] sm:$0xff]  ;;  %v779_v61 = vld [vmem:[#allocation12 + $0x8] sm:$0xff] }
 0x224   :  { %v497_v0 = vrot.slane %v496_v62, 2 }
 0x226   :  { %v498_v1 = vmax.f32 %v496_v62, %v497_v0  ;;  %v780_v0 = vld [vmem:[#allocation12 + $0x10] sm:$0xff] }
 0x228   :  { %v499_v3 = vrot.slane %v498_v1, 1 }
 0x22a   :  { %v500_v5 = vmax.f32 %v498_v1, %v499_v3  ;;  %v781_v1 = vld [vmem:[#allocation12 + $0x18] sm:$0xff]  ;;  %v782_v3 = vld [vmem:[#allocation12 + $0x20] sm:$0xff] }
 0x22c   :  { %v501_v7 = vmax.f32 %v486_v4, %v500_v5  ;;  %v784_v5 = vld [vmem:[#allocation12 + $0x30] sm:$0xff] }
 0x22e   :  { %503 = vst.msk [vmem:[#allocation2] sm:$0x1] %vm174_vm0, %v501_v7  ;;  %v508_v8 = vrot.slane %v501_v7, %v507_v6  ;;  %v731_v9 = vsub.f32 %v486_v4, %v501_v7  ;;  %v783_v4 = vld [vmem:[#allocation12 + $0x28] sm:$0xff]  ;;  %v785_v7 = vld [vmem:[#allocation12 + $0x38] sm:$0xff] }
 0x230   :  { %v510_v10 = vsub.f32 %v482_v49, %v508_v8  ;;  %v511_v11 = vsub.f32 %v483_v55, %v508_v8  ;;  %v512_v12 = vsub.f32 %v484_v47, %v508_v8  ;;  %v513_v13 = vsub.f32 %v485_v51, %v508_v8  ;;  %v607_v51 = vpop.trf.xlu0 }
 0x231   :  { %v732_v44 = vmul.f32 1.442695, %v731_v9  ;;  %v1652_v47 = vmov 0.0  }
 0x232   :  { %v516_v14 = vmul.f32 1.442695, %v511_v11  ;;  %v518_v15 = vmul.f32 1.442695, %v512_v12  ;;  %v514_v16 = vmul.f32 1.442695, %v510_v10 }
 0x233   :  { %v520_v17 = vmul.f32 1.442695, %v513_v13  ;;  %v788_v11 = vld [vmem:[#allocation12 + $0x50] sm:$0xff] }
 0x234   :  { %1497 = vpow2.f32 %v516_v14  ;;  %v608_v52 = vpop.trf.xlu0 }
 0x235   :  { %1499 = vpow2.f32 %v518_v15 }
 0x236   :  { %1501 = vpow2.f32 %v520_v17 }
 0x237   :  { %1503 = vpow2.f32 %v514_v16 }
 0x238   :  { %1505 = vpow2.f32 %v732_v44 }
 0x23e   :  { %v1498_v18 = vpop.eup %1497 }
 0x23f   :  { %v1500_v19 = vpop.eup %1499 }
 0x240   :  { %v1502_v20 = vpop.eup %1501 }
 0x241   :  { %v1504_v21 = vpop.eup %1503  ;;  %v523_v22 = vpack.c.bf16 %v1502_v20, %v1500_v19 }
 0x242   :  { %v522_v23 = vpack.c.bf16 %v1498_v18, %v1504_v21  ;;  %v1506_v49 = vpop.eup %1505 }
 0x243   :  { %v734_v50 = vpack.c.bf16 %v1506_v49, %v1506_v49 }
 0x244   :  { %1381 = vmatprep.mubr.msk.bf16.mxu0 %vm487_vm5, %v522_v23 }
 0x245   :  { %1382 = vmatmul.mubr.msk.bf16.vlgmr.msra.gmra.mrb[4].mxu0 %vm487_vm5, %v523_v22 }
 0x246   :  { %1389 = vmatprep.mubr.msk.bf16.mxu0 %vm609_vm7, %v601_v24  ;;  %v786_v24 = vld [vmem:[#allocation12 + $0x40] sm:$0xff] }
 0x318   :  { %v1383_v31 = vpop.f32.mrb[4].mxu0 }
 0x319   :  { %v568_v34 = vpop.f32.mrb[5].mxu0  ;;  %v589_v36 = vmul.f32 %v1383_v31, %v1284_v29  ;;  %v792_v29 = vld [vmem:[#allocation12 + $0x70] sm:$0xff] }
 0x31a   :  { %v1384_v35 = vpop.f32.mrb[6].mxu0  ;;  %v587_v39 = vmul.f32 %v1280_v32, %v568_v34 }
 0x31b   :  { %v590_v37 = vmul.f32 %v1384_v35, %v1285_v30  ;;  %v571_v38 = vpop.f32.mrb[7].mxu0  ;;  %v790_v30 = vld [vmem:[#allocation12 + $0x60] sm:$0xff]  ;;  %v793_v35 = vld [vmem:[#allocation12 + $0x78] sm:$0xff] }
 0x31c   :  { %v588_v40 = vmul.f32 %v1281_v33, %v571_v38 }
 0x31d   :  { %v592_v43 = vpack.c.bf16 %v590_v37, %v589_v36 }
 0x31e   :  { %v591_v45 = vpack.c.bf16 %v588_v40, %v587_v39  ;;  %v791_v40 = vld [vmem:[#allocation12 + $0x68] sm:$0xff] }
 0x320   :  { %1385 = vmatprep.subr.bf16.mxu0 %v591_v45  ;;  %1443 = vmatprep.subr.bf16.mxu1 %v591_v45 }
 0x321   :  { %1386 = vmatpush3.bf16.msra.mxu0 %v591_v45  ;;  %1445 = vmatpush3.bf16.msra.mxu1 %v591_v45 }
 0x322   :  { %1387 = vmatprep.subr.bf16.mxu0 %v592_v43  ;;  %1444 = vmatprep.subr.bf16.mxu1 %v592_v43 }
 0x325   :  { %1388 = vmatpush3.bf16.msra.mxu0 %v592_v43  ;;  %1446 = vmatpush3.bf16.msra.mxu1 %v592_v43 }
 0x326   :  { %1405 = vmatprep.subr.bf16.mxu0 %v1652_v47 }
 0x328   :  { %1390 = vmatmul.mubr.msk.bf16.vlgmr.msra.gmra.mrb[8].mxu0 %vm609_vm7, %v602_v25  ;;  %1394 = vmatmul.mubr.msk.bf16.vlgmr.msra.gmra.mrb[4].mxu1 %vm609_vm7, %v604_v42  ;;  %v789_v25 = vld [vmem:[#allocation12 + $0x58] sm:$0xff] }
 0x329   :  { %1397 = vmatprep.mubr.msk.bf16.mxu1 %vm609_vm7, %v605_v46  ;;  %1406 = vmatpush3.bf16.msra.mxu0 %v1848_v41 }
 0x32a   :  { %1407 = vmatprep.mubr.msk.bf16.mxu0 %vm1653_vm8, %v1652_v47 }
 0x330   :  { %1398 = vmatmul.mubr.msk.bf16.gmra.mrb[8].mxu1 %vm609_vm7, %v606_v48  ;;  %1408 = vmatmul.mubr.msk.bf16.vlgmr.msra.gmra.mrb[12].mxu0 %vm487_vm5, %v734_v50 }
 0x331   :  { %1401 = vmatprep.mubr.msk.bf16.mxu1 %vm609_vm7, %v607_v51 }
 0x338   :  { %1402 = vmatmul.mubr.msk.bf16.gmra.mrb[12].mxu1 %vm609_vm7, %v608_v52 }
 0x3fb   :  { %v1391_v53 = vpop.f32.mrb[8].mxu0  ;;  %v1395_v54 = vpop.f32.mrb[4].mxu1 }
 0x3fc   :  { %v668_v55 = vpop.f32.mrb[9].mxu0  ;;  %v684_v56 = vpop.f32.mrb[5].mxu1 }
 0x3fd   :  { %v1392_v57 = vpop.f32.mrb[10].mxu0  ;;  %v1396_v41 = vpop.f32.mrb[6].mxu1 }
 0x3fe   :  { %v671_v58 = vpop.f32.mrb[11].mxu0  ;;  %v687_v59 = vpop.f32.mrb[7].mxu1 }
 0x403   :  { %v1399_v62 = vpop.f32.mrb[8].mxu1  ;;  %v772_v63 = vpop.f32.mrb[12].mxu0 }
 0x404   :  { %v797_v8 = vrot.slane %v772_v63, %v507_v6  ;;  %v700_v9 = vpop.f32.mrb[9].mxu1  ;;  %v1409_v10 = vpop.f32.mrb[13].mxu0 }
 0x405   :  { %v1400_v12 = vpop.f32.mrb[10].mxu1  ;;  %v775_v13 = vpop.f32.mrb[14].mxu0 }
 0x406   :  { %v798_v14 = vmul.f32 %v797_v8, %v778_v60  ;;  %v799_v15 = vmul.f32 %v797_v8, %v779_v61  ;;  %v800_v16 = vmul.f32 %v797_v8, %v780_v0  ;;  %v801_v17 = vmul.f32 %v797_v8, %v781_v1  ;;  %v703_v18 = vpop.f32.mrb[11].mxu1  ;;  %v1410_v19 = vpop.f32.mrb[15].mxu0 }
 0x407   :  { %v802_v20 = vmul.f32 %v797_v8, %v782_v3  ;;  %v803_v21 = vmul.f32 %v797_v8, %v783_v4  ;;  %v804_v22 = vmul.f32 %v797_v8, %v784_v5  ;;  %v805_v23 = vmul.f32 %v797_v8, %v785_v7 }
 0x408   :  { %v808_v26 = vmul.f32 %v797_v8, %v788_v11  ;;  %v814_v2 = vadd.f32 %v798_v14, %v668_v55  ;;  %v815_v6 = vadd.f32 %v799_v15, %v671_v58  ;;  %v816_v27 = vadd.f32 %v1391_v53, %v800_v16 }
 0x409   :  { %v817_v31 = vadd.f32 %v1392_v57, %v801_v17  ;;  %v818_v32 = vadd.f32 %v802_v20, %v684_v56  ;;  %v819_v33 = vadd.f32 %v803_v21, %v687_v59  ;;  %v820_v34 = vadd.f32 %v1395_v54, %v804_v22 }
 0x40a   :  { %v821_v36 = vadd.f32 %v1396_v41, %v805_v23  ;;  %v824_v37 = vadd.f32 %v1399_v62, %v808_v26  ;;  %830 = vst [vmem:[#allocation12] sm:$0xff] %v814_v2  ;;  %831 = vst [vmem:[#allocation12 + $0x8] sm:$0xff] %v815_v6  ;;  %v806_v38 = vmul.f32 %v797_v8, %v786_v24 }
 0x40b   :  { %832 = vst [vmem:[#allocation12 + $0x10] sm:$0xff] %v816_v27  ;;  %v809_v39 = vmul.f32 %v797_v8, %v789_v25  ;;  %833 = vst [vmem:[#allocation12 + $0x18] sm:$0xff] %v817_v31  ;;  %v807_v42 = vmul.f32 %v797_v8, %v787_v28  ;;  %v1403_v43 = vpop.f32.mrb[12].mxu1  ;;  %v812_v44 = vmul.f32 %v797_v8, %v792_v29 }
 0x40c   :  { %834 = vst [vmem:[#allocation12 + $0x20] sm:$0xff] %v818_v32  ;;  %835 = vst [vmem:[#allocation12 + $0x28] sm:$0xff] %v819_v33  ;;  %v810_v45 = vmul.f32 %v797_v8, %v790_v30  ;;  %v822_v46 = vadd.f32 %v806_v38, %v700_v9  ;;  %v716_v48 = vpop.f32.mrb[13].mxu1  ;;  %v813_v49 = vmul.f32 %v797_v8, %v793_v35 }
 0x40d   :  { %836 = vst [vmem:[#allocation12 + $0x30] sm:$0xff] %v820_v34  ;;  %837 = vst [vmem:[#allocation12 + $0x38] sm:$0xff] %v821_v36  ;;  %v825_v47 = vadd.f32 %v1400_v12, %v809_v39  ;;  %v823_v50 = vadd.f32 %v807_v42, %v703_v18  ;;  %v828_v51 = vadd.f32 %v1403_v43, %v812_v44  ;;  %v1404_v53 = vpop.f32.mrb[14].mxu1 }
 0x40e   :  { %840 = vst [vmem:[#allocation12 + $0x50] sm:$0xff] %v824_v37  ;;  %v826_v52 = vadd.f32 %v810_v45, %v716_v48  ;;  %v811_v54 = vmul.f32 %v797_v8, %v791_v40  ;;  %838 = vst [vmem:[#allocation12 + $0x40] sm:$0xff] %v822_v46  ;;  %v829_v55 = vadd.f32 %v1404_v53, %v813_v49  ;;  %v719_v56 = vpop.f32.mrb[15].mxu1 }
 0x40f   :  { %841 = vst [vmem:[#allocation12 + $0x58] sm:$0xff] %v825_v47  ;;  %839 = vst [vmem:[#allocation12 + $0x48] sm:$0xff] %v823_v50 }
 0x410   :  { %844 = vst [vmem:[#allocation12 + $0x70] sm:$0xff] %v828_v51  ;;  %842 = vst [vmem:[#allocation12 + $0x60] sm:$0xff] %v826_v52  ;;  %v827_v57 = vadd.f32 %v811_v54, %v719_v56 }
 0x411   :  { %845 = vst [vmem:[#allocation12 + $0x78] sm:$0xff] %v829_v55 }
 0x412   :  { %843 = vst [vmem:[#allocation12 + $0x68] sm:$0xff] %v827_v57 }
 0x413 PF:  { %v1507_v41 = vld [vmem:[#allocation11] sm:$0xff]   ;;  %v1508_v58 = vld [vmem:[#allocation11 + $0x8] sm:$0xff]   ;;  %v1509_v59 = vld [vmem:[#allocation11 + $0x10] sm:$0xff]   ;;  %s1654_s7 = smov [#allocation12]  }
 0x414   :  { %1411 = vmatprep.subr.bf16.mxu0 %v1507_v41  ;;  %1447 = vmatprep.subr.bf16.mxu1 %v1507_v41  ;;  %v1510_v60 = vld [vmem:[#allocation11 + $0x18] sm:$0xff]   ;;  %v1875_v61 = vld [vmem:[#allocation12] sm:$0xff]  ;;  %v1877_v62 = vld [vmem:[#allocation12 + $0x8] sm:$0xff]  ;;  %s1183_s12 = sshll.u32 %s1654_s7, 4  ;;  %s1184_s12 = int_to_ptr.vmem [resolvable:$true] %s1183_s12 }
 0x415   :  { %1412 = vmatpush3.bf16.msra.mxu0 %v1507_v41  ;;  %1455 = vmatpush3.bf16.msra.mxu1 %v1507_v41  ;;  %v865_v0 = vpack.c.bf16 %v1877_v62, %v1875_v61  ;;  %v1511_v4 = vld [vmem:[#allocation11 + $0x20] sm:$0xff]   ;;  %v1512_v5 = vld [vmem:[#allocation11 + $0x28] sm:$0xff]   ;;  %v1513_v7 = vld [vmem:[#allocation11 + $0x30] sm:$0xff]   ;;  %s1617_s2 = scalar_lea.vmem %s1184_s12, 2048  ;;  %p1622_p8 = scmp.lt.s32.totalorder %s1184_s12, %s1184_s12 }
 0x416   :  { %1413 = vmatprep.subr.bf16.mxu0 %v1508_v58  ;;  %1448 = vmatprep.subr.bf16.mxu1 %v1508_v58  ;;  %v1879_v63 = vld [vmem:[#allocation12 + $0x40] sm:$0xff]  ;;  %v1883_v1 = vld [vmem:[#allocation12 + $0x48] sm:$0xff]  ;;  %v1514_v8 = vld [vmem:[#allocation11 + $0x38] sm:$0xff]   ;;  %p1618_p7 = scmp.ne.s32.totalorder %s1184_s12, %s1617_s2  ;;  %p1623_p9 = scmp.lt.s32.totalorder %s1617_s2, %s1617_s2 }
 0x417   :  { %v869_v3 = vpack.c.bf16 %v1883_v1, %v1879_v63  ;;  %1427 = vmatprep.mubr.bf16.mxu0 %v865_v0  ;;  %v1887_v9 = vld [vmem:[#allocation12 + $0x10] sm:$0xff]  ;;  %v1889_v10 = vld [vmem:[#allocation12 + $0x18] sm:$0xff]  ;;  %v1895_v13 = vld [vmem:[#allocation12 + $0x20] sm:$0xff] }
 0x418   :  { %v1891_v11 = vld [vmem:[#allocation12 + $0x50] sm:$0xff]  ;;  %v1893_v12 = vld [vmem:[#allocation12 + $0x58] sm:$0xff]  ;;  %v1897_v14 = vld [vmem:[#allocation12 + $0x28] sm:$0xff]  ;;  %v866_v17 = vpack.c.bf16 %v1889_v10, %v1887_v9  ;;  %p1624_p10 = por %p1623_p9, %p1622_p8 }
 0x419   :  { %1414 = vmatpush3.bf16.msra.mxu0 %v1508_v58  ;;  %1456 = vmatpush3.bf16.msra.mxu1 %v1508_v58  ;;  %2130 = vst [vmem:[#allocation16_spill] sm:$0xff] %v1897_v14  ;;  %v1899_v15 = vld [vmem:[#allocation12 + $0x60] sm:$0xff]  ;;  %v1901_v16 = vld [vmem:[#allocation12 + $0x68] sm:$0xff]  ;;  %v870_v18 = vpack.c.bf16 %v1893_v12, %v1891_v11  ;;  %v867_v19 = vpack.c.bf16 %v1897_v14, %v1895_v13  ;;  %v1911_v21 = vld [vmem:[#allocation12 + $0x30] sm:$0xff] }
 0x41a   :  { %1415 = vmatprep.subr.bf16.mxu0 %v1509_v59  ;;  %1449 = vmatprep.subr.bf16.mxu1 %v1509_v59  ;;  %2131 = vst [vmem:[#allocation17_spill] sm:$0xff] %v1901_v16  ;;  %v871_v20 = vpack.c.bf16 %v1901_v16, %v1899_v15  ;;  %v1913_v22 = vld [vmem:[#allocation12 + $0x38] sm:$0xff]  ;;  %v1915_v23 = vld [vmem:[#allocation12 + $0x70] sm:$0xff]  ;;  %p1625_p11 = pnand %p1624_p10, %p1618_p7 }
 0x41b   :  { %1435 = vmatprep.mubr.bf16.mxu1 %v869_v3  ;;  %v1917_v24 = vld [vmem:[#allocation12 + $0x78] sm:$0xff]  ;;  %v868_v25 = vpack.c.bf16 %v1913_v22, %v1911_v21 }
 0x41c   :  { %v872_v26 = vpack.c.bf16 %v1917_v24, %v1915_v23 }
 0x41d   :  { %1416 = vmatpush3.bf16.msra.mxu0 %v1509_v59  ;;  %1457 = vmatpush3.bf16.msra.mxu1 %v1509_v59 }
 0x41e   :  { %1417 = vmatprep.subr.bf16.mxu0 %v1510_v60  ;;  %1450 = vmatprep.subr.bf16.mxu1 %v1510_v60 }
 0x421   :  { %1418 = vmatpush3.bf16.msra.mxu0 %v1510_v60  ;;  %1458 = vmatpush3.bf16.msra.mxu1 %v1510_v60 }
 0x422   :  { %1419 = vmatprep.subr.bf16.mxu0 %v1511_v4  ;;  %1451 = vmatprep.subr.bf16.mxu1 %v1511_v4 }
 0x425   :  { %1420 = vmatpush3.bf16.msra.mxu0 %v1511_v4  ;;  %1459 = vmatpush3.bf16.msra.mxu1 %v1511_v4 }
 0x426   :  { %1421 = vmatprep.subr.bf16.mxu0 %v1512_v5  ;;  %1452 = vmatprep.subr.bf16.mxu1 %v1512_v5 }
 0x429   :  { %1422 = vmatpush3.bf16.msra.mxu0 %v1512_v5  ;;  %1460 = vmatpush3.bf16.msra.mxu1 %v1512_v5 }
 0x42a   :  { %1423 = vmatprep.subr.bf16.mxu0 %v1513_v7  ;;  %1453 = vmatprep.subr.bf16.mxu1 %v1513_v7 }
 0x42d   :  { %1424 = vmatpush3.bf16.msra.mxu0 %v1513_v7  ;;  %1461 = vmatpush3.bf16.msra.mxu1 %v1513_v7 }
 0x42e   :  { %1425 = vmatprep.subr.bf16.mxu0 %v1514_v8  ;;  %1454 = vmatprep.subr.bf16.mxu1 %v1514_v8 }
 0x431   :  { %1426 = vmatpush3.bf16.msra.mxu0 %v1514_v8  ;;  %1462 = vmatpush3.bf16.msra.mxu1 %v1514_v8 }
 0x434   :  { %1428 = vmatmul.mubr.bf16.vlgmr.msra.gmra.mrb[0].mxu0 %v866_v17  ;;  %1436 = vmatmul.mubr.bf16.vlgmr.msra.gmra.mrb[0].mxu1 %v870_v18 }
 0x435   :  { %1431 = vmatprep.mubr.bf16.mxu0 %v867_v19  ;;  %1439 = vmatprep.mubr.bf16.mxu1 %v871_v20 }
 0x43c   :  { %1432 = vmatmul.mubr.bf16.gmra.mrb[4].mxu0 %v868_v25  ;;  %1440 = vmatmul.mubr.bf16.gmra.mrb[4].mxu1 %v872_v26 }
 0x507   :  { %v1923_v2 = vpop.f32.mrb[0].mxu0  ;;  %v1925_v6 = vpop.f32.mrb[0].mxu1 }
 0x508   :  { %vm1036_vm9 = vcmp.gt.f32.partialorder %v1923_v2, 0.0  ;;  %vm1044_vm10 = vcmp.gt.f32.partialorder %v1925_v6, 0.0  ;;  %v1929_v27 = vpop.f32.mrb[1].mxu0  ;;  %v1931_v28 = vpop.f32.mrb[1].mxu1 }
 0x509   :  { %v1052_v29 = vsel %vm1036_vm9, %v1923_v2, 1.0  ;;  %v1060_v30 = vsel %vm1044_vm10, %v1925_v6, 1.0  ;;  %vm1034_vm11 = vcmp.gt.f32.partialorder %v1929_v27, 0.0  ;;  %vm1042_vm12 = vcmp.gt.f32.partialorder %v1931_v28, 0.0  ;;  %v1941_v31 = vpop.f32.mrb[2].mxu0  ;;  %v1943_v32 = vpop.f32.mrb[2].mxu1 }
 0x50a   :  { %1515 = vrcp.f32 %v1052_v29  ;;  %v1050_v33 = vsel %vm1034_vm11, %v1929_v27, 1.0  ;;  %v1058_v34 = vsel %vm1042_vm12, %v1931_v28, 1.0  ;;  %vm1037_vm13 = vcmp.gt.f32.partialorder %v1941_v31, 0.0  ;;  %v1952_v35 = vpop.f32.mrb[3].mxu0  ;;  %v1954_v36 = vpop.f32.mrb[3].mxu1 }
 0x50b   :  { %1517 = vrcp.f32 %v1060_v30  ;;  %v1053_v37 = vsel %vm1037_vm13, %v1941_v31, 1.0  ;;  %vm1045_vm14 = vcmp.gt.f32.partialorder %v1943_v32, 0.0  ;;  %vm1035_vm15 = vcmp.gt.f32.partialorder %v1952_v35, 0.0 }
 0x50c   :  { %1519 = vrcp.f32 %v1050_v33  ;;  %v1061_v38 = vsel %vm1045_vm14, %v1943_v32, 1.0  ;;  %vm1043_vm0 = vcmp.gt.f32.partialorder %v1954_v36, 0.0  ;;  %v1051_v39 = vsel %vm1035_vm15, %v1952_v35, 1.0 }
 0x50d   :  { %1521 = vrcp.f32 %v1058_v34  ;;  %v1971_v40 = vsel %vm1043_vm0, %v1954_v36, 1.0 }
 0x50e   :  { %1523 = vrcp.f32 %v1053_v37 }
 0x50f   :  { %1525 = vrcp.f32 %v1061_v38  ;;  %v1973_v42 = vpop.f32.mrb[4].mxu0  ;;  %v1975_v43 = vpop.f32.mrb[4].mxu1 }
 0x510   :  { %1527 = vrcp.f32 %v1051_v39  ;;  %vm1040_vm1 = vcmp.gt.f32.partialorder %v1973_v42, 0.0  ;;  %vm1048_vm2 = vcmp.gt.f32.partialorder %v1975_v43, 0.0  ;;  %v1979_v44 = vpop.f32.mrb[5].mxu0  ;;  %v1981_v45 = vpop.f32.mrb[5].mxu1 }
 0x511   :  { %1529 = vrcp.f32 %v1971_v40  ;;  %v1987_v46 = vsel %vm1040_vm1, %v1973_v42, 1.0  ;;  %v1992_v47 = vsel %vm1048_vm2, %v1975_v43, 1.0  ;;  %vm1038_vm3 = vcmp.gt.f32.partialorder %v1979_v44, 0.0  ;;  %v1995_v48 = vpop.f32.mrb[6].mxu0  ;;  %v1997_v49 = vpop.f32.mrb[6].mxu1 }
 0x512   :  { %1531 = vrcp.f32 %v1987_v46  ;;  %v2003_v50 = vsel %vm1038_vm3, %v1979_v44, 1.0  ;;  %vm1046_vm4 = vcmp.gt.f32.partialorder %v1981_v45, 0.0  ;;  %vm1041_vm5 = vcmp.gt.f32.partialorder %v1995_v48, 0.0  ;;  %v2007_v51 = vpop.f32.mrb[7].mxu0  ;;  %v2009_v52 = vpop.f32.mrb[7].mxu1 }
 0x513   :  { %2132 = vst [vmem:[#allocation18_spill] sm:$0xff] %v2007_v51  ;;  %2133 = vst [vmem:[#allocation19_spill] sm:$0xff] %v2009_v52  ;;  %1533 = vrcp.f32 %v1992_v47  ;;  %v2015_v53 = vsel %vm1046_vm4, %v1981_v45, 1.0  ;;  %v2020_v54 = vsel %vm1041_vm5, %v1995_v48, 1.0  ;;  %vm1049_vm6 = vcmp.gt.f32.partialorder %v1997_v49, 0.0 }
 0x514   :  { %v1516_v55 = vpop.eup %1515  ;;  %1535 = vrcp.f32 %v2003_v50  ;;  %v2027_v56 = vsel %vm1049_vm6, %v1997_v49, 1.0  ;;  %vm1039_vm7 = vcmp.gt.f32.partialorder %v2007_v51, 0.0  ;;  %vm1047_vm8 = vcmp.gt.f32.partialorder %v2009_v52, 0.0  ;;  %v2137_v49 = vld [vmem:[#allocation17_spill] sm:$0xff] }
 0x515   :  { %v1518_v57 = vpop.eup %1517  ;;  %v1084_v41 = vmul.f32 %v1516_v55, %v1052_v29  ;;  %1537 = vrcp.f32 %v2015_v53  ;;  %v2035_v58 = vsel %vm1039_vm7, %v2007_v51, 1.0  ;;  %v2042_v5 = vsel %vm1047_vm8, %v2009_v52, 1.0 }
 0x516   :  { %v1520_v59 = vpop.eup %1519  ;;  %v1092_v60 = vmul.f32 %v1518_v57, %v1060_v30  ;;  %1539 = vrcp.f32 %v2020_v54 }
 0x517   :  { %v1522_v0 = vpop.eup %1521  ;;  %v1100_v3 = vsub.f32 2.0, %v1084_v41  ;;  %v1082_v4 = vmul.f32 %v1520_v59, %v1050_v33  ;;  %1541 = vrcp.f32 %v2027_v56 }
 0x518   :  { %v1524_v7 = vpop.eup %1523  ;;  %v1108_v8 = vsub.f32 2.0, %v1092_v60  ;;  %v1090_v17 = vmul.f32 %v1522_v0, %v1058_v34  ;;  %1543 = vrcp.f32 %v2035_v58 }
 0x519   :  { %v1526_v18 = vpop.eup %1525  ;;  %v1116_v19 = vmul.f32 %v1516_v55, %v1100_v3  ;;  %v1098_v20 = vsub.f32 2.0, %v1082_v4  ;;  %v1085_v25 = vmul.f32 %v1524_v7, %v1053_v37  ;;  %1545 = vrcp.f32 %v2042_v5 }
 0x51a   :  { %v1528_v26 = vpop.eup %1527  ;;  %v1124_v29 = vmul.f32 %v1518_v57, %v1108_v8  ;;  %v1106_v30 = vsub.f32 2.0, %v1090_v17  ;;  %v1093_v33 = vmul.f32 %v1526_v18, %v1061_v38 }
 0x51b   :  { %v1530_v41 = vpop.eup %1529  ;;  %v1132_v16 = vsel %vm1036_vm9, %v1116_v19, 0.0  ;;  %v1114_v52 = vmul.f32 %v1520_v59, %v1098_v20  ;;  %v1101_v14 = vsub.f32 2.0, %v1085_v25  ;;  %v1083_v60 = vmul.f32 %v1528_v26, %v1051_v39 }
 0x51c   :  { %v1532_v34 = vpop.eup %1531  ;;  %v1148_v51 = vmul.f32 %v1132_v16, %v1887_v9  ;;  %v1140_v55 = vsel %vm1044_vm10, %v1124_v29, 0.0  ;;  %v1122_v37 = vmul.f32 %v1522_v0, %v1106_v30  ;;  %v1109_v3 = vsub.f32 2.0, %v1093_v33 }
 0x51d   :  { %v1534_v57 = vpop.eup %1533  ;;  %v1156_v38 = vmul.f32 %v1140_v55, %v1891_v11  ;;  %v1130_v4 = vsel %vm1034_vm11, %v1114_v52, 0.0  ;;  %v1117_v8 = vmul.f32 %v1524_v7, %v1101_v14  ;;  %v1099_v2 = vsub.f32 2.0, %v1083_v60 }
 0x51e   :  { %v1536_v17 = vpop.eup %1535  ;;  %1164 = vst [vmem:[#allocation12 + $0x10] sm:$0xff] %v1148_v51  ;;  %v1146_v39 = vmul.f32 %v1130_v4, %v1875_v61  ;;  %v1138_v9 = vsel %vm1042_vm12, %v1122_v37, 0.0  ;;  %v1125_v16 = vmul.f32 %v1526_v18, %v1109_v3  ;;  %v1091_v6 = vmul.f32 %v1530_v41, %v1971_v40 }
 0x51f   :  { %v1538_v59 = vpop.eup %1537  ;;  %1172 = vst [vmem:[#allocation12 + $0x50] sm:$0xff] %v1156_v38  ;;  %v1154_v0 = vmul.f32 %v1138_v9, %v1879_v63  ;;  %v1133_v11 = vsel %vm1037_vm13, %v1117_v8, 0.0  ;;  %v1115_v27 = vmul.f32 %v1528_v26, %v1099_v2  ;;  %v1088_v14 = vmul.f32 %v1532_v34, %v1987_v46 }
 0x520   :  { %v1540_v52 = vpop.eup %1539  ;;  %1162 = vst [vmem:[#allocation12] sm:$0xff] %v1146_v39  ;;  %v1149_v61 = vmul.f32 %v1133_v11, %v1889_v10  ;;  %v1141_v28 = vsel %vm1045_vm14, %v1125_v16, 0.0  ;;  %v1107_v51 = vsub.f32 2.0, %v1091_v6  ;;  %v1096_v40 = vmul.f32 %v1534_v57, %v1992_v47 }
 0x521   :  { %v1542_v7 = vpop.eup %1541  ;;  %1170 = vst [vmem:[#allocation12 + $0x40] sm:$0xff] %v1154_v0  ;;  %v1157_v63 = vmul.f32 %v1141_v28, %v1893_v12  ;;  %v1131_v31 = vsel %vm1035_vm15, %v1115_v27, 0.0  ;;  %v1104_v18 = vsub.f32 2.0, %v1088_v14  ;;  %v1086_v46 = vmul.f32 %v1536_v17, %v2003_v50 }
 0x522   :  { %v1544_v19 = vpop.eup %1543  ;;  %1165 = vst [vmem:[#allocation12 + $0x18] sm:$0xff] %v1149_v61  ;;  %v1147_v10 = vmul.f32 %v1131_v31, %v1877_v62  ;;  %v1123_v20 = vmul.f32 %v1530_v41, %v1107_v51  ;;  %v1112_v32 = vsub.f32 2.0, %v1096_v40  ;;  %v1094_v25 = vmul.f32 %v1538_v59, %v2015_v53 }
 0x523   :  { %1173 = vst [vmem:[#allocation12 + $0x58] sm:$0xff] %v1157_v63  ;;  %v1120_v47 = vmul.f32 %v1532_v34, %v1104_v18  ;;  %v1102_v26 = vsub.f32 2.0, %v1086_v46  ;;  %v1089_v29 = vmul.f32 %v1540_v52, %v2020_v54  ;;  %v1097_v12 = vmul.f32 %v1542_v7, %v2027_v56  ;;  %v1546_v35 = vpop.eup %1545 }
 0x524   :  { %1163 = vst [vmem:[#allocation12 + $0x8] sm:$0xff] %v1147_v10  ;;  %v1139_v50 = vsel %vm1043_vm0, %v1123_v20, 0.0  ;;  %v1128_v30 = vmul.f32 %v1534_v57, %v1112_v32  ;;  %v1110_v33 = vsub.f32 2.0, %v1094_v25  ;;  %v1087_v62 = vmul.f32 %v1544_v19, %v2035_v58 }
 0x525   :  { %v1155_v41 = vmul.f32 %v1139_v50, %v1883_v1  ;;  %v1136_v53 = vsel %vm1040_vm1, %v1120_v47, 0.0  ;;  %v1118_v60 = vmul.f32 %v1536_v17, %v1102_v26  ;;  %v1105_v34 = vsub.f32 2.0, %v1089_v29 }
 0x526   :  { %v1152_v54 = vmul.f32 %v1136_v53, %v1911_v21  ;;  %v1144_v56 = vsel %vm1048_vm2, %v1128_v30, 0.0  ;;  %v1126_v55 = vmul.f32 %v1538_v59, %v1110_v33  ;;  %v1113_v37 = vsub.f32 2.0, %v1097_v12 }
 0x527   :  { %1171 = vst [vmem:[#allocation12 + $0x48] sm:$0xff] %v1155_v41  ;;  %v1160_v36 = vmul.f32 %v1144_v56, %v1915_v23  ;;  %v1134_v58 = vsel %vm1038_vm3, %v1118_v60, 0.0  ;;  %v1121_v3 = vmul.f32 %v1540_v52, %v1105_v34  ;;  %v1103_v1 = vsub.f32 2.0, %v1087_v62 }
 0x528   :  { %1168 = vst [vmem:[#allocation12 + $0x30] sm:$0xff] %v1152_v54  ;;  %v1150_v42 = vmul.f32 %v1134_v58, %v1895_v13  ;;  %v1142_v57 = vsel %vm1046_vm4, %v1126_v55, 0.0  ;;  %v1129_v21 = vmul.f32 %v1542_v7, %v1113_v37  ;;  %v1095_v43 = vmul.f32 %v1546_v35, %v2042_v5 }
 0x529   :  { %1176 = vst [vmem:[#allocation12 + $0x70] sm:$0xff] %v1160_v36  ;;  %v1158_v38 = vmul.f32 %v1142_v57, %v1899_v15  ;;  %v1137_v23 = vsel %vm1041_vm5, %v1121_v3, 0.0  ;;  %v1119_v4 = vmul.f32 %v1544_v19, %v1103_v1  ;;  %v2135_v15 = vld [vmem:[#allocation16_spill] sm:$0xff] }
 0x52a   :  { %1166 = vst [vmem:[#allocation12 + $0x20] sm:$0xff] %v1150_v42  ;;  %v1153_v44 = vmul.f32 %v1137_v23, %v1913_v22  ;;  %v1145_v8 = vsel %vm1049_vm6, %v1129_v21, 0.0  ;;  %v1111_v13 = vsub.f32 2.0, %v1095_v43 }
 0x52b   :  { %1174 = vst [vmem:[#allocation12 + $0x60] sm:$0xff] %v1158_v38  ;;  %v1161_v45 = vmul.f32 %v1145_v8, %v1917_v24  ;;  %v1135_v5 = vsel %vm1039_vm7, %v1119_v4, 0.0 }
 0x52c   :  { %1169 = vst [vmem:[#allocation12 + $0x38] sm:$0xff] %v1153_v44  ;;  %v1151_v48 = vmul.f32 %v1135_v5, %v2135_v15  ;;  %v1127_v17 = vmul.f32 %v1546_v35, %v1111_v13 }
 0x52d   :  { %1177 = vst [vmem:[#allocation12 + $0x78] sm:$0xff] %v1161_v45 }
 0x52e   :  { %1167 = vst [vmem:[#allocation12 + $0x28] sm:$0xff] %v1151_v48  ;;  %v1143_v22 = vsel %vm1047_vm8, %v1127_v17, 0.0 }
 0x52f   :  { %v1159_v9 = vmul.f32 %v1143_v22, %v2137_v49 }
 0x531   :  { %1175 = vst [vmem:[#allocation12 + $0x68] sm:$0xff] %v1159_v9 }
 0x532   :  { %1628 = shalt.err (!%p1625_p11)
}
 0x533   :  { %s1629_s3 = scalar_lea.hbm %s2124_s9, 2048 }
 0x534   :  { %p1630_p12 = scmp.ne.s32.totalorder %s2124_s9, %s1629_s3  ;;  %p1633_p13 = scmp.lt.u32.totalorder %s1629_s3, %s2124_s9 }
 0x536   :  { %p1635_p0 = pnand %p1633_p13, %p1630_p12 }
 0x538   :  { %1638 = shalt.err (!%p1635_p0)
}
 0x539   :  { %s1655_s29 = smov 128   ;;  %s1656_s30 = smov 8  }
 0x53a   :  { %1189 = dma.vmem_to_hbm [thread:$0]  %s1184_s12, 2048, %s2124_s9, [#allocation8], %s1655_s29, %s1655_s29, %s1656_s30  }
 0x53b   :  { %1643 = dma.done.wait [#allocation8], 2048  }
 0x53c   :  { %1644 = vsyncadd [#allocation8], 4294965248 }
 0x53d   :  { %1193 = vsyncpa [#allocation7], 1 }
 0x53e   :  { %1194 = vsyncpa [#allocation10], 1 }
 0x53f   :  { %1195 = vsyncpa [#allocation8], 1 }

</bundles_post_ra>
